<compile_context>
chip_gen: v7x
topology: tpu7x:2x2x1
jax: 0.10.0
libtpu: 0.0.40
codegen_flags: <defaults>
</compile_context>

<pallas_src>
import jax
import jax.numpy as jnp
import numpy as np
from jax.experimental import pallas as pl
from jax.experimental.pallas import tpu as pltpu

INPUT_SIZE = 128
HIDDEN = 64          # 4*H = 256 = 2 lane tiles, 2*H = 128 = 1 lane tile
FC1 = 32
FC2 = 16
LANES = 128          # lane width for the padded MLP head / output slab


def audio_lstm_kernel(x_ref,                       # (chunk*BP, INPUT_SIZE)
                      wih1_ref, b1_ref,            # (D, 4H), (1, 4H)
                      wf_ref, b2_ref,              # (2H, 8H) fused [[Whh1,Wih2],[0,Whh2]], (1, 4H)
                      wfc1_ref, bfc1_ref,          # (H, 128), (1, 128)
                      wfc2_ref, bfc2_ref,          # (128, 128), (1, 128)
                      wout_ref, bout_ref,          # (128, 128), (1, 128)
                      out_ref,                     # (BP, 128)
                      h1_ref, c1_ref, h2_ref, c2_ref,   # (BP, H) each, persist across chunks
                      g1rec_ref):                  # (BP, 4H), persists across chunks
    step = pl.program_id(0)
    bp = out_ref.shape[0]
    chunk = x_ref.shape[0] // bp
    h = h1_ref.shape[1]

    # ---- Init carried state on the first chunk.
    @pl.when(step == 0)
    def _():
        h1_ref[...] = jnp.zeros_like(h1_ref)
        c1_ref[...] = jnp.zeros_like(c1_ref)
        h2_ref[...] = jnp.zeros_like(h2_ref)
        c2_ref[...] = jnp.zeros_like(c2_ref)
        g1rec_ref[...] = jnp.zeros_like(g1rec_ref)

    # ---- Hoisted layer-1 input projection for this chunk (no h-dependency).
    gates_in1 = (jnp.dot(x_ref[...], wih1_ref[...],
                         preferred_element_type=jnp.float32)
                 + b1_ref[...])                               # (chunk*BP, 4H)

    # Hoist weight / bias loads (and bias broadcast) out of the unrolled loop.
    wf = wf_ref[...]                                          # (2H, 8H)
    b2 = jnp.broadcast_to(b2_ref[...], (bp, 4 * h))

    h1 = h1_ref[...]
    c1 = c1_ref[...]
    h2 = h2_ref[...]
    c2 = c2_ref[...]
    g1rec = g1rec_ref[...]

    def gate_act(gates, c):
        # PyTorch gate order: i, f, g, o (each H=64 lanes wide).
        i = jax.nn.sigmoid(gates[:, 0 * h:1 * h])
        f = jax.nn.sigmoid(gates[:, 1 * h:2 * h])
        g = jnp.tanh(gates[:, 2 * h:3 * h])
        o = jax.nn.sigmoid(gates[:, 3 * h:4 * h])
        c_new = f * c + i * g
        h_new = o * jnp.tanh(c_new)
        return h_new, c_new

    # ---- Skewed recurrence over this chunk (static unroll; chunk is small).
    for t in range(chunk):
        # Layer-1 gates: hoisted input part + carried recurrent part h1(t-1)@Whh1.
        g1 = gates_in1[t * bp:(t + 1) * bp, :] + g1rec
        h1, c1 = gate_act(g1, c1)

        # ONE fused MXU pass: [h1(t), h2(t-1)] @ [[Whh1, Wih2], [0, Whh2]].
        m = jnp.dot(jnp.concatenate([h1, h2], axis=-1), wf,
                    preferred_element_type=jnp.float32)       # (BP, 8H)
        g1rec = m[:, :4 * h]                                  # -> next step's layer-1 recurrent part
        g2 = m[:, 4 * h:] + b2                                # layer-2 gates at step t
        h2, c2 = gate_act(g2, c2)

    # ---- Carry state to the next chunk.
    h1_ref[...] = h1
    c1_ref[...] = c1
    h2_ref[...] = h2
    c2_ref[...] = c2
    g1rec_ref[...] = g1rec

    # ---- Epilogue: MLP head on hn[-1] == h2, lane-dense output store.
    @pl.when(step == pl.num_programs(0) - 1)
    def _():
        z = jnp.maximum(
            jnp.dot(h2, wfc1_ref[...], preferred_element_type=jnp.float32)
            + bfc1_ref[...], 0.0)
        z = jnp.maximum(
            jnp.dot(z, wfc2_ref[...], preferred_element_type=jnp.float32)
            + bfc2_ref[...], 0.0)
        logits = (jnp.dot(z, wout_ref[...], preferred_element_type=jnp.float32)
                  + bout_ref[...])
        out_ref[...] = jax.nn.sigmoid(logits)                 # (BP, 128)


# ----------------------------------------------------------------------------
# Wrapper: fuse/pad weights into kernel layouts and call Pallas.
# ----------------------------------------------------------------------------
def _pad_rows(w, rp):
    k, n = w.shape
    return jnp.zeros((rp, n), w.dtype).at[:k, :].set(w)


def _pad_cols(w, cp):
    k, n = w.shape
    return jnp.zeros((k, cp), w.dtype).at[:, :n].set(w)


def _pack_params(p):
    H = HIDDEN
    # Fused recurrent weight: rows 0..H-1 multiply h1, rows H..2H-1 multiply h2.
    wf = jnp.zeros((2 * H, 8 * H), jnp.float32)
    wf = wf.at[:H, :4 * H].set(p["whh1"])      # h1 @ Whh1   -> g1_rec (next step)
    wf = wf.at[:H, 4 * H:].set(p["wih2"])      # h1 @ Wih2   -> g2
    wf = wf.at[H:, 4 * H:].set(p["whh2"])      # h2 @ Whh2   -> g2

    wfc1 = _pad_cols(p["wfc1"], LANES)                         # (64, 128)
    bfc1 = _pad_cols(p["bfc1"], LANES)                         # (1, 128)
    wfc2 = _pad_cols(_pad_rows(p["wfc2"], LANES), LANES)       # (128, 128)
    bfc2 = _pad_cols(p["bfc2"], LANES)                         # (1, 128)
    wout = _pad_cols(_pad_rows(p["wout"], LANES), LANES)       # (128, 128)
    bout = _pad_cols(p["bout"], LANES)                         # (1, 128)

    return dict(wih1=p["wih1"], b1=p["b1"], wf=wf, b2=p["b2"],
                wfc1=wfc1, bfc1=bfc1, wfc2=wfc2, bfc2=bfc2,
                wout=wout, bout=bout)


def _pick_chunk(T, max_chunk):
    for c in range(min(T, max_chunk), 0, -1):
        if T % c == 0:
            return c
    return 1


def audio_lstm_forward(x, params, max_chunk_t=4):
    """x: (B, T, INPUT_SIZE) batch_first, like the PyTorch module."""
    B, T, D = x.shape
    assert D == INPUT_SIZE
    BP = -(-B // 8) * 8                                        # batch padded to >= 8 sublanes
    chunk_t = _pick_chunk(T, max_chunk_t)                      # timesteps per grid step
    n_chunks = T // chunk_t

    kp = _pack_params(params)

    x_tm = jnp.transpose(x, (1, 0, 2))                         # time-major (T, B, D)
    x_tm = jnp.pad(x_tm, ((0, 0), (0, BP - B), (0, 0)))        # zero-pad batch rows
    x2d = x_tm.reshape(T * BP, D)                              # (T*BP, D)

    order = ["wih1", "b1", "wf", "b2",
             "wfc1", "bfc1", "wfc2", "bfc2", "wout", "bout"]
    vals = [kp[k] for k in order]

    def const_spec(shape):
        nd = len(shape)
        return pl.BlockSpec(shape, lambda i, nd=nd: (0,) * nd)

    in_specs = ([pl.BlockSpec((chunk_t * BP, D), lambda i: (i, 0))]
                + [const_spec(v.shape) for v in vals])
    out_specs = pl.BlockSpec((BP, LANES), lambda i: (0, 0))

    out_padded = pl.pallas_call(
        audio_lstm_kernel,
        out_shape=jax.ShapeDtypeStruct((BP, LANES), jnp.float32),
        grid_spec=pltpu.PrefetchScalarGridSpec(
            num_scalar_prefetch=0,
            grid=(n_chunks,),
            in_specs=in_specs,
            out_specs=out_specs,
            scratch_shapes=[
                pltpu.VMEM((BP, HIDDEN), jnp.float32),         # h1
                pltpu.VMEM((BP, HIDDEN), jnp.float32),         # c1
                pltpu.VMEM((BP, HIDDEN), jnp.float32),         # h2
                pltpu.VMEM((BP, HIDDEN), jnp.float32),         # c2
                pltpu.VMEM((BP, 4 * HIDDEN), jnp.float32),     # g1_rec carry
            ]),
        compiler_params=pltpu.CompilerParams(
            dimension_semantics=("arbitrary",)),
    )(x2d, *vals)

    return out_padded[:B, :1]


# ----------------------------------------------------------------------------
# Deterministic init (PyTorch-equivalent shapes, weights stored transposed).
# ----------------------------------------------------------------------------
def init_params(key):
    ks = jax.random.split(key, 16)
    klstm = 1.0 / np.sqrt(HIDDEN)

    def u(k, shape, bound):
        return jax.random.uniform(k, shape, jnp.float32, -bound, bound)

    params = {
        # Layer-1 LSTM: W_ih (4H, IN) -> transposed (IN, 4H); W_hh (4H, H) -> (H, 4H)
        "wih1": u(ks[0], (INPUT_SIZE, 4 * HIDDEN), klstm),
        "whh1": u(ks[1], (HIDDEN, 4 * HIDDEN), klstm),
        "b1": u(ks[2], (1, 4 * HIDDEN), klstm) + u(ks[3], (1, 4 * HIDDEN), klstm),
        # Layer-2 LSTM: input is layer-1 hidden
        "wih2": u(ks[4], (HIDDEN, 4 * HIDDEN), klstm),
        "whh2": u(ks[5], (HIDDEN, 4 * HIDDEN), klstm),
        "b2": u(ks[6], (1, 4 * HIDDEN), klstm) + u(ks[7], (1, 4 * HIDDEN), klstm),
        # fc1: (32, 64) -> transposed (64, 32)
        "wfc1": u(ks[8], (HIDDEN, FC1), 1.0 / np.sqrt(HIDDEN)),
        "bfc1": u(ks[9], (1, FC1), 1.0 / np.sqrt(HIDDEN)),
        # fc2: (16, 32) -> transposed (32, 16)
        "wfc2": u(ks[10], (FC1, FC2), 1.0 / np.sqrt(FC1)),
        "bfc2": u(ks[11], (1, FC2), 1.0 / np.sqrt(FC1)),
        # out: (1, 16) -> transposed (16, 1)
        "wout": u(ks[12], (FC2, 1), 1.0 / np.sqrt(FC2)),
        "bout": u(ks[13], (1, 1), 1.0 / np.sqrt(FC2)),
    }
    return params


def reference_forward(x, p):
    """Pure-JAX reference of the PyTorch forward (eval mode)."""
    B, T, _ = x.shape
    h1 = jnp.zeros((B, HIDDEN), jnp.float32)
    c1 = jnp.zeros((B, HIDDEN), jnp.float32)
    h2 = jnp.zeros((B, HIDDEN), jnp.float32)
    c2 = jnp.zeros((B, HIDDEN), jnp.float32)

    def cell(inp, h, c, wih, whh, b):
        g = inp @ wih + h @ whh + b
        i = jax.nn.sigmoid(g[:, 0 * HIDDEN:1 * HIDDEN])
        f = jax.nn.sigmoid(g[:, 1 * HIDDEN:2 * HIDDEN])
        gg = jnp.tanh(g[:, 2 * HIDDEN:3 * HIDDEN])
        o = jax.nn.sigmoid(g[:, 3 * HIDDEN:4 * HIDDEN])
        c = f * c + i * gg
        h = o * jnp.tanh(c)
        return h, c

    for t in range(T):
        h1, c1 = cell(x[:, t], h1, c1, p["wih1"], p["whh1"], p["b1"])
        h2, c2 = cell(h1, h2, c2, p["wih2"], p["whh2"], p["b2"])

    z = jnp.maximum(h2 @ p["wfc1"] + p["bfc1"], 0.0)
    z = jnp.maximum(z @ p["wfc2"] + p["bfc2"], 0.0)
    return jax.nn.sigmoid(z @ p["wout"] + p["bout"])


if __name__ == "__main__":
    key = jax.random.PRNGKey(0)
    kx, kp = jax.random.split(key)

    B, T = 2, 8
    x = jax.random.normal(kx, (B, T, INPUT_SIZE), jnp.float32)
    params = init_params(kp)

    out = audio_lstm_forward(x, params)        # T=8, chunk=4 -> grid=(2,)
    out = jax.block_until_ready(out)

    ref = jax.block_until_ready(reference_forward(x, params))
    assert out.shape == (B, 1)
    np.testing.assert_allclose(np.asarray(out), np.asarray(ref), atol=1e-4, rtol=1e-4)

    print("KERNEL_OK")
</pallas_src>

<mosaic_0001>
module attributes {stable_mosaic.version = 11 : i64} {
  func.func @audio_lstm_kernel(%arg0: i32, %arg1: memref<32x128xf32, #tpu.memory_space<vmem>>, %arg2: memref<128x256xf32, #tpu.memory_space<vmem>>, %arg3: memref<1x256xf32, #tpu.memory_space<vmem>>, %arg4: memref<128x512xf32, #tpu.memory_space<vmem>>, %arg5: memref<1x256xf32, #tpu.memory_space<vmem>>, %arg6: memref<64x128xf32, #tpu.memory_space<vmem>>, %arg7: memref<1x128xf32, #tpu.memory_space<vmem>>, %arg8: memref<128x128xf32, #tpu.memory_space<vmem>>, %arg9: memref<1x128xf32, #tpu.memory_space<vmem>>, %arg10: memref<128x128xf32, #tpu.memory_space<vmem>>, %arg11: memref<1x128xf32, #tpu.memory_space<vmem>>, %arg12: memref<8x128xf32, #tpu.memory_space<vmem>>, %arg13: memref<8x64xf32, #tpu.memory_space<vmem>>, %arg14: memref<8x64xf32, #tpu.memory_space<vmem>>, %arg15: memref<8x64xf32, #tpu.memory_space<vmem>>, %arg16: memref<8x64xf32, #tpu.memory_space<vmem>>, %arg17: memref<8x256xf32, #tpu.memory_space<vmem>>) attributes {dimension_semantics = [#tpu.dimension_semantics<arbitrary>], iteration_bounds = array<i64: 2>, scalar_prefetch = 0 : i64, scratch_operands = 5 : i64, tpu.core_type = #tpu.core_type<tc>, window_params = [{transform_indices = @transform_0, window_bounds = array<i64: 32, 128>}, {pipeline_mode = #tpu.pipeline_mode<synchronous>, transform_indices = @transform_1, window_bounds = array<i64: 128, 256>}, {pipeline_mode = #tpu.pipeline_mode<synchronous>, transform_indices = @transform_2, window_bounds = array<i64: 1, 256>}, {pipeline_mode = #tpu.pipeline_mode<synchronous>, transform_indices = @transform_3, window_bounds = array<i64: 128, 512>}, {pipeline_mode = #tpu.pipeline_mode<synchronous>, transform_indices = @transform_4, window_bounds = array<i64: 1, 256>}, {pipeline_mode = #tpu.pipeline_mode<synchronous>, transform_indices = @transform_5, window_bounds = array<i64: 64, 128>}, {pipeline_mode = #tpu.pipeline_mode<synchronous>, transform_indices = @transform_6, window_bounds = array<i64: 1, 128>}, {pipeline_mode = #tpu.pipeline_mode<synchronous>, transform_indices = @transform_7, window_bounds = array<i64: 128, 128>}, {pipeline_mode = #tpu.pipeline_mode<synchronous>, transform_indices = @transform_8, window_bounds = array<i64: 1, 128>}, {pipeline_mode = #tpu.pipeline_mode<synchronous>, transform_indices = @transform_9, window_bounds = array<i64: 128, 128>}, {pipeline_mode = #tpu.pipeline_mode<synchronous>, transform_indices = @transform_10, window_bounds = array<i64: 1, 128>}, {pipeline_mode = #tpu.pipeline_mode<synchronous>, transform_indices = @transform_11, window_bounds = array<i64: 8, 128>}]} {
    %c0_i32 = arith.constant 0 : i32
    %0 = arith.cmpi eq, %arg0, %c0_i32 : i32
    %1 = arith.extui %0 : i1 to i32
    %c0_i32_0 = arith.constant 0 : i32
    %2 = arith.cmpi ne, %1, %c0_i32_0 : i32
    scf.if %2 {
      %cst_57 = arith.constant 0.000000e+00 : f32
      %253 = vector.broadcast %cst_57 : f32 to vector<8x64xf32>
      %c0_58 = arith.constant 0 : index
      %c0_59 = arith.constant 0 : index
      %254 = vector.load %arg13[%c0_58, %c0_59] : memref<8x64xf32, #tpu.memory_space<vmem>>, vector<8x64xf32>
      tpu.vector_store %arg13[%c0_58, %c0_59], %253 {strides = array<i32>} : memref<8x64xf32, #tpu.memory_space<vmem>>, vector<8x64xf32>,
      %cst_60 = arith.constant 0.000000e+00 : f32
      %255 = vector.broadcast %cst_60 : f32 to vector<8x64xf32>
      %c0_61 = arith.constant 0 : index
      %c0_62 = arith.constant 0 : index
      %256 = vector.load %arg14[%c0_61, %c0_62] : memref<8x64xf32, #tpu.memory_space<vmem>>, vector<8x64xf32>
      tpu.vector_store %arg14[%c0_61, %c0_62], %255 {strides = array<i32>} : memref<8x64xf32, #tpu.memory_space<vmem>>, vector<8x64xf32>,
      %cst_63 = arith.constant 0.000000e+00 : f32
      %257 = vector.broadcast %cst_63 : f32 to vector<8x64xf32>
      %c0_64 = arith.constant 0 : index
      %c0_65 = arith.constant 0 : index
      %258 = vector.load %arg15[%c0_64, %c0_65] : memref<8x64xf32, #tpu.memory_space<vmem>>, vector<8x64xf32>
      tpu.vector_store %arg15[%c0_64, %c0_65], %257 {strides = array<i32>} : memref<8x64xf32, #tpu.memory_space<vmem>>, vector<8x64xf32>,
      %cst_66 = arith.constant 0.000000e+00 : f32
      %259 = vector.broadcast %cst_66 : f32 to vector<8x64xf32>
      %c0_67 = arith.constant 0 : index
      %c0_68 = arith.constant 0 : index
      %260 = vector.load %arg16[%c0_67, %c0_68] : memref<8x64xf32, #tpu.memory_space<vmem>>, vector<8x64xf32>
      tpu.vector_store %arg16[%c0_67, %c0_68], %259 {strides = array<i32>} : memref<8x64xf32, #tpu.memory_space<vmem>>, vector<8x64xf32>,
      %cst_69 = arith.constant 0.000000e+00 : f32
      %261 = vector.broadcast %cst_69 : f32 to vector<8x256xf32>
      %c0_70 = arith.constant 0 : index
      %c0_71 = arith.constant 0 : index
      %262 = vector.load %arg17[%c0_70, %c0_71] : memref<8x256xf32, #tpu.memory_space<vmem>>, vector<8x256xf32>
      tpu.vector_store %arg17[%c0_70, %c0_71], %261 {strides = array<i32>} : memref<8x256xf32, #tpu.memory_space<vmem>>, vector<8x256xf32>,
    } else {
    }
    %c0 = arith.constant 0 : index
    %c0_1 = arith.constant 0 : index
    %3 = vector.load %arg1[%c0, %c0_1] : memref<32x128xf32, #tpu.memory_space<vmem>>, vector<32x128xf32>
    %c0_2 = arith.constant 0 : index
    %c0_3 = arith.constant 0 : index
    %4 = vector.load %arg2[%c0_2, %c0_3] : memref<128x256xf32, #tpu.memory_space<vmem>>, vector<128x256xf32>
    %cst = arith.constant dense<0.000000e+00> : vector<32x256xf32>
    %5 = tpu.matmul %3, %4, %cst {dimension_numbers = #tpu.dot_dimension_numbers<[1], [0], [0], [1], [0, 0, 1, 1], [], []>} : vector<32x128xf32>, vector<128x256xf32>, vector<32x256xf32> -> vector<32x256xf32>
    %c0_4 = arith.constant 0 : index
    %c0_5 = arith.constant 0 : index
    %6 = vector.load %arg3[%c0_4, %c0_5] : memref<1x256xf32, #tpu.memory_space<vmem>>, vector<1x256xf32>
    %7 = vector.broadcast %6 : vector<1x256xf32> to vector<32x256xf32>
    %8 = arith.addf %5, %7 : vector<32x256xf32>
    %c0_6 = arith.constant 0 : index
    %c0_7 = arith.constant 0 : index
    %9 = vector.load %arg4[%c0_6, %c0_7] : memref<128x512xf32, #tpu.memory_space<vmem>>, vector<128x512xf32>
    %c0_8 = arith.constant 0 : index
    %c0_9 = arith.constant 0 : index
    %10 = vector.load %arg5[%c0_8, %c0_9] : memref<1x256xf32, #tpu.memory_space<vmem>>, vector<1x256xf32>
    %11 = vector.shape_cast %10 : vector<1x256xf32> to vector<1x256xf32>
    %12 = vector.broadcast %11 : vector<1x256xf32> to vector<8x256xf32>
    %c0_10 = arith.constant 0 : index
    %c0_11 = arith.constant 0 : index
    %13 = vector.load %arg14[%c0_10, %c0_11] : memref<8x64xf32, #tpu.memory_space<vmem>>, vector<8x64xf32>
    %c0_12 = arith.constant 0 : index
    %c0_13 = arith.constant 0 : index
    %14 = vector.load %arg15[%c0_12, %c0_13] : memref<8x64xf32, #tpu.memory_space<vmem>>, vector<8x64xf32>
    %c0_14 = arith.constant 0 : index
    %c0_15 = arith.constant 0 : index
    %15 = vector.load %arg16[%c0_14, %c0_15] : memref<8x64xf32, #tpu.memory_space<vmem>>, vector<8x64xf32>
    %c0_16 = arith.constant 0 : index
    %c0_17 = arith.constant 0 : index
    %16 = vector.load %arg17[%c0_16, %c0_17] : memref<8x256xf32, #tpu.memory_space<vmem>>, vector<8x256xf32>
    %17 = vector.extract_strided_slice %8 {offsets = [0, 0], sizes = [8, 256], strides = [1, 1]} : vector<32x256xf32> to vector<8x256xf32>
    %18 = arith.addf %17, %16 : vector<8x256xf32>
    %19 = vector.extract_strided_slice %18 {offsets = [0, 0], sizes = [8, 64], strides = [1, 1]} : vector<8x256xf32> to vector<8x64xf32>
    %20 = arith.negf %19 : vector<8x64xf32>
    %21 = math.exp %20 : vector<8x64xf32>
    %cst_18 = arith.constant 1.000000e+00 : f32
    %22 = vector.broadcast %cst_18 : f32 to vector<8x64xf32>
    %23 = arith.addf %22, %21 : vector<8x64xf32>
    %24 = arith.divf %22, %23 : vector<8x64xf32>
    %25 = vector.extract_strided_slice %18 {offsets = [0, 64], sizes = [8, 64], strides = [1, 1]} : vector<8x256xf32> to vector<8x64xf32>
    %26 = arith.negf %25 : vector<8x64xf32>
    %27 = math.exp %26 : vector<8x64xf32>
    %cst_19 = arith.constant 1.000000e+00 : f32
    %28 = vector.broadcast %cst_19 : f32 to vector<8x64xf32>
    %29 = arith.addf %28, %27 : vector<8x64xf32>
    %30 = arith.divf %28, %29 : vector<8x64xf32>
    %31 = vector.extract_strided_slice %18 {offsets = [0, 128], sizes = [8, 64], strides = [1, 1]} : vector<8x256xf32> to vector<8x64xf32>
    %32 = math.tanh %31 : vector<8x64xf32>
    %33 = vector.extract_strided_slice %18 {offsets = [0, 192], sizes = [8, 64], strides = [1, 1]} : vector<8x256xf32> to vector<8x64xf32>
    %34 = arith.negf %33 : vector<8x64xf32>
    %35 = math.exp %34 : vector<8x64xf32>
    %cst_20 = arith.constant 1.000000e+00 : f32
    %36 = vector.broadcast %cst_20 : f32 to vector<8x64xf32>
    %37 = arith.addf %36, %35 : vector<8x64xf32>
    %38 = arith.divf %36, %37 : vector<8x64xf32>
    %39 = arith.mulf %30, %13 : vector<8x64xf32>
    %40 = arith.mulf %24, %32 : vector<8x64xf32>
    %41 = arith.addf %39, %40 : vector<8x64xf32>
    %42 = math.tanh %41 : vector<8x64xf32>
    %43 = arith.mulf %38, %42 : vector<8x64xf32>
    %44 = tpu.concatenate %43, %14 in 1 : vector<8x64xf32>, vector<8x64xf32> -> vector<8x128xf32>
    %cst_21 = arith.constant dense<0.000000e+00> : vector<8x512xf32>
    %45 = tpu.matmul %44, %9, %cst_21 {dimension_numbers = #tpu.dot_dimension_numbers<[1], [0], [0], [1], [0, 0, 1, 1], [], []>} : vector<8x128xf32>, vector<128x512xf32>, vector<8x512xf32> -> vector<8x512xf32>
    %46 = vector.extract_strided_slice %45 {offsets = [0, 0], sizes = [8, 256], strides = [1, 1]} : vector<8x512xf32> to vector<8x256xf32>
    %47 = vector.extract_strided_slice %45 {offsets = [0, 256], sizes = [8, 256], strides = [1, 1]} : vector<8x512xf32> to vector<8x256xf32>
    %48 = arith.addf %47, %12 : vector<8x256xf32>
    %49 = vector.extract_strided_slice %48 {offsets = [0, 0], sizes = [8, 64], strides = [1, 1]} : vector<8x256xf32> to vector<8x64xf32>
    %50 = arith.negf %49 : vector<8x64xf32>
    %51 = math.exp %50 : vector<8x64xf32>
    %cst_22 = arith.constant 1.000000e+00 : f32
    %52 = vector.broadcast %cst_22 : f32 to vector<8x64xf32>
    %53 = arith.addf %52, %51 : vector<8x64xf32>
    %54 = arith.divf %52, %53 : vector<8x64xf32>
    %55 = vector.extract_strided_slice %48 {offsets = [0, 64], sizes = [8, 64], strides = [1, 1]} : vector<8x256xf32> to vector<8x64xf32>
    %56 = arith.negf %55 : vector<8x64xf32>
    %57 = math.exp %56 : vector<8x64xf32>
    %cst_23 = arith.constant 1.000000e+00 : f32
    %58 = vector.broadcast %cst_23 : f32 to vector<8x64xf32>
    %59 = arith.addf %58, %57 : vector<8x64xf32>
    %60 = arith.divf %58, %59 : vector<8x64xf32>
    %61 = vector.extract_strided_slice %48 {offsets = [0, 128], sizes = [8, 64], strides = [1, 1]} : vector<8x256xf32> to vector<8x64xf32>
    %62 = math.tanh %61 : vector<8x64xf32>
    %63 = vector.extract_strided_slice %48 {offsets = [0, 192], sizes = [8, 64], strides = [1, 1]} : vector<8x256xf32> to vector<8x64xf32>
    %64 = arith.negf %63 : vector<8x64xf32>
    %65 = math.exp %64 : vector<8x64xf32>
    %cst_24 = arith.constant 1.000000e+00 : f32
    %66 = vector.broadcast %cst_24 : f32 to vector<8x64xf32>
    %67 = arith.addf %66, %65 : vector<8x64xf32>
    %68 = arith.divf %66, %67 : vector<8x64xf32>
    %69 = arith.mulf %60, %15 : vector<8x64xf32>
    %70 = arith.mulf %54, %62 : vector<8x64xf32>
    %71 = arith.addf %69, %70 : vector<8x64xf32>
    %72 = math.tanh %71 : vector<8x64xf32>
    %73 = arith.mulf %68, %72 : vector<8x64xf32>
    %74 = vector.extract_strided_slice %8 {offsets = [8, 0], sizes = [8, 256], strides = [1, 1]} : vector<32x256xf32> to vector<8x256xf32>
    %75 = arith.addf %74, %46 : vector<8x256xf32>
    %76 = vector.extract_strided_slice %75 {offsets = [0, 0], sizes = [8, 64], strides = [1, 1]} : vector<8x256xf32> to vector<8x64xf32>
    %77 = arith.negf %76 : vector<8x64xf32>
    %78 = math.exp %77 : vector<8x64xf32>
    %cst_25 = arith.constant 1.000000e+00 : f32
    %79 = vector.broadcast %cst_25 : f32 to vector<8x64xf32>
    %80 = arith.addf %79, %78 : vector<8x64xf32>
    %81 = arith.divf %79, %80 : vector<8x64xf32>
    %82 = vector.extract_strided_slice %75 {offsets = [0, 64], sizes = [8, 64], strides = [1, 1]} : vector<8x256xf32> to vector<8x64xf32>
    %83 = arith.negf %82 : vector<8x64xf32>
    %84 = math.exp %83 : vector<8x64xf32>
    %cst_26 = arith.constant 1.000000e+00 : f32
    %85 = vector.broadcast %cst_26 : f32 to vector<8x64xf32>
    %86 = arith.addf %85, %84 : vector<8x64xf32>
    %87 = arith.divf %85, %86 : vector<8x64xf32>
    %88 = vector.extract_strided_slice %75 {offsets = [0, 128], sizes = [8, 64], strides = [1, 1]} : vector<8x256xf32> to vector<8x64xf32>
    %89 = math.tanh %88 : vector<8x64xf32>
    %90 = vector.extract_strided_slice %75 {offsets = [0, 192], sizes = [8, 64], strides = [1, 1]} : vector<8x256xf32> to vector<8x64xf32>
    %91 = arith.negf %90 : vector<8x64xf32>
    %92 = math.exp %91 : vector<8x64xf32>
    %cst_27 = arith.constant 1.000000e+00 : f32
    %93 = vector.broadcast %cst_27 : f32 to vector<8x64xf32>
    %94 = arith.addf %93, %92 : vector<8x64xf32>
    %95 = arith.divf %93, %94 : vector<8x64xf32>
    %96 = arith.mulf %87, %41 : vector<8x64xf32>
    %97 = arith.mulf %81, %89 : vector<8x64xf32>
    %98 = arith.addf %96, %97 : vector<8x64xf32>
    %99 = math.tanh %98 : vector<8x64xf32>
    %100 = arith.mulf %95, %99 : vector<8x64xf32>
    %101 = tpu.concatenate %100, %73 in 1 : vector<8x64xf32>, vector<8x64xf32> -> vector<8x128xf32>
    %cst_28 = arith.constant dense<0.000000e+00> : vector<8x512xf32>
    %102 = tpu.matmul %101, %9, %cst_28 {dimension_numbers = #tpu.dot_dimension_numbers<[1], [0], [0], [1], [0, 0, 1, 1], [], []>} : vector<8x128xf32>, vector<128x512xf32>, vector<8x512xf32> -> vector<8x512xf32>
    %103 = vector.extract_strided_slice %102 {offsets = [0, 0], sizes = [8, 256], strides = [1, 1]} : vector<8x512xf32> to vector<8x256xf32>
    %104 = vector.extract_strided_slice %102 {offsets = [0, 256], sizes = [8, 256], strides = [1, 1]} : vector<8x512xf32> to vector<8x256xf32>
    %105 = arith.addf %104, %12 : vector<8x256xf32>
    %106 = vector.extract_strided_slice %105 {offsets = [0, 0], sizes = [8, 64], strides = [1, 1]} : vector<8x256xf32> to vector<8x64xf32>
    %107 = arith.negf %106 : vector<8x64xf32>
    %108 = math.exp %107 : vector<8x64xf32>
    %cst_29 = arith.constant 1.000000e+00 : f32
    %109 = vector.broadcast %cst_29 : f32 to vector<8x64xf32>
    %110 = arith.addf %109, %108 : vector<8x64xf32>
    %111 = arith.divf %109, %110 : vector<8x64xf32>
    %112 = vector.extract_strided_slice %105 {offsets = [0, 64], sizes = [8, 64], strides = [1, 1]} : vector<8x256xf32> to vector<8x64xf32>
    %113 = arith.negf %112 : vector<8x64xf32>
    %114 = math.exp %113 : vector<8x64xf32>
    %cst_30 = arith.constant 1.000000e+00 : f32
    %115 = vector.broadcast %cst_30 : f32 to vector<8x64xf32>
    %116 = arith.addf %115, %114 : vector<8x64xf32>
    %117 = arith.divf %115, %116 : vector<8x64xf32>
    %118 = vector.extract_strided_slice %105 {offsets = [0, 128], sizes = [8, 64], strides = [1, 1]} : vector<8x256xf32> to vector<8x64xf32>
    %119 = math.tanh %118 : vector<8x64xf32>
    %120 = vector.extract_strided_slice %105 {offsets = [0, 192], sizes = [8, 64], strides = [1, 1]} : vector<8x256xf32> to vector<8x64xf32>
    %121 = arith.negf %120 : vector<8x64xf32>
    %122 = math.exp %121 : vector<8x64xf32>
    %cst_31 = arith.constant 1.000000e+00 : f32
    %123 = vector.broadcast %cst_31 : f32 to vector<8x64xf32>
    %124 = arith.addf %123, %122 : vector<8x64xf32>
    %125 = arith.divf %123, %124 : vector<8x64xf32>
    %126 = arith.mulf %117, %71 : vector<8x64xf32>
    %127 = arith.mulf %111, %119 : vector<8x64xf32>
    %128 = arith.addf %126, %127 : vector<8x64xf32>
    %129 = math.tanh %128 : vector<8x64xf32>
    %130 = arith.mulf %125, %129 : vector<8x64xf32>
    %131 = vector.extract_strided_slice %8 {offsets = [16, 0], sizes = [8, 256], strides = [1, 1]} : vector<32x256xf32> to vector<8x256xf32>
    %132 = arith.addf %131, %103 : vector<8x256xf32>
    %133 = vector.extract_strided_slice %132 {offsets = [0, 0], sizes = [8, 64], strides = [1, 1]} : vector<8x256xf32> to vector<8x64xf32>
    %134 = arith.negf %133 : vector<8x64xf32>
    %135 = math.exp %134 : vector<8x64xf32>
    %cst_32 = arith.constant 1.000000e+00 : f32
    %136 = vector.broadcast %cst_32 : f32 to vector<8x64xf32>
    %137 = arith.addf %136, %135 : vector<8x64xf32>
    %138 = arith.divf %136, %137 : vector<8x64xf32>
    %139 = vector.extract_strided_slice %132 {offsets = [0, 64], sizes = [8, 64], strides = [1, 1]} : vector<8x256xf32> to vector<8x64xf32>
    %140 = arith.negf %139 : vector<8x64xf32>
    %141 = math.exp %140 : vector<8x64xf32>
    %cst_33 = arith.constant 1.000000e+00 : f32
    %142 = vector.broadcast %cst_33 : f32 to vector<8x64xf32>
    %143 = arith.addf %142, %141 : vector<8x64xf32>
    %144 = arith.divf %142, %143 : vector<8x64xf32>
    %145 = vector.extract_strided_slice %132 {offsets = [0, 128], sizes = [8, 64], strides = [1, 1]} : vector<8x256xf32> to vector<8x64xf32>
    %146 = math.tanh %145 : vector<8x64xf32>
    %147 = vector.extract_strided_slice %132 {offsets = [0, 192], sizes = [8, 64], strides = [1, 1]} : vector<8x256xf32> to vector<8x64xf32>
    %148 = arith.negf %147 : vector<8x64xf32>
    %149 = math.exp %148 : vector<8x64xf32>
    %cst_34 = arith.constant 1.000000e+00 : f32
    %150 = vector.broadcast %cst_34 : f32 to vector<8x64xf32>
    %151 = arith.addf %150, %149 : vector<8x64xf32>
    %152 = arith.divf %150, %151 : vector<8x64xf32>
    %153 = arith.mulf %144, %98 : vector<8x64xf32>
    %154 = arith.mulf %138, %146 : vector<8x64xf32>
    %155 = arith.addf %153, %154 : vector<8x64xf32>
    %156 = math.tanh %155 : vector<8x64xf32>
    %157 = arith.mulf %152, %156 : vector<8x64xf32>
    %158 = tpu.concatenate %157, %130 in 1 : vector<8x64xf32>, vector<8x64xf32> -> vector<8x128xf32>
    %cst_35 = arith.constant dense<0.000000e+00> : vector<8x512xf32>
    %159 = tpu.matmul %158, %9, %cst_35 {dimension_numbers = #tpu.dot_dimension_numbers<[1], [0], [0], [1], [0, 0, 1, 1], [], []>} : vector<8x128xf32>, vector<128x512xf32>, vector<8x512xf32> -> vector<8x512xf32>
    %160 = vector.extract_strided_slice %159 {offsets = [0, 0], sizes = [8, 256], strides = [1, 1]} : vector<8x512xf32> to vector<8x256xf32>
    %161 = vector.extract_strided_slice %159 {offsets = [0, 256], sizes = [8, 256], strides = [1, 1]} : vector<8x512xf32> to vector<8x256xf32>
    %162 = arith.addf %161, %12 : vector<8x256xf32>
    %163 = vector.extract_strided_slice %162 {offsets = [0, 0], sizes = [8, 64], strides = [1, 1]} : vector<8x256xf32> to vector<8x64xf32>
    %164 = arith.negf %163 : vector<8x64xf32>
    %165 = math.exp %164 : vector<8x64xf32>
    %cst_36 = arith.constant 1.000000e+00 : f32
    %166 = vector.broadcast %cst_36 : f32 to vector<8x64xf32>
    %167 = arith.addf %166, %165 : vector<8x64xf32>
    %168 = arith.divf %166, %167 : vector<8x64xf32>
    %169 = vector.extract_strided_slice %162 {offsets = [0, 64], sizes = [8, 64], strides = [1, 1]} : vector<8x256xf32> to vector<8x64xf32>
    %170 = arith.negf %169 : vector<8x64xf32>
    %171 = math.exp %170 : vector<8x64xf32>
    %cst_37 = arith.constant 1.000000e+00 : f32
    %172 = vector.broadcast %cst_37 : f32 to vector<8x64xf32>
    %173 = arith.addf %172, %171 : vector<8x64xf32>
    %174 = arith.divf %172, %173 : vector<8x64xf32>
    %175 = vector.extract_strided_slice %162 {offsets = [0, 128], sizes = [8, 64], strides = [1, 1]} : vector<8x256xf32> to vector<8x64xf32>
    %176 = math.tanh %175 : vector<8x64xf32>
    %177 = vector.extract_strided_slice %162 {offsets = [0, 192], sizes = [8, 64], strides = [1, 1]} : vector<8x256xf32> to vector<8x64xf32>
    %178 = arith.negf %177 : vector<8x64xf32>
    %179 = math.exp %178 : vector<8x64xf32>
    %cst_38 = arith.constant 1.000000e+00 : f32
    %180 = vector.broadcast %cst_38 : f32 to vector<8x64xf32>
    %181 = arith.addf %180, %179 : vector<8x64xf32>
    %182 = arith.divf %180, %181 : vector<8x64xf32>
    %183 = arith.mulf %174, %128 : vector<8x64xf32>
    %184 = arith.mulf %168, %176 : vector<8x64xf32>
    %185 = arith.addf %183, %184 : vector<8x64xf32>
    %186 = math.tanh %185 : vector<8x64xf32>
    %187 = arith.mulf %182, %186 : vector<8x64xf32>
    %188 = vector.extract_strided_slice %8 {offsets = [24, 0], sizes = [8, 256], strides = [1, 1]} : vector<32x256xf32> to vector<8x256xf32>
    %189 = arith.addf %188, %160 : vector<8x256xf32>
    %190 = vector.extract_strided_slice %189 {offsets = [0, 0], sizes = [8, 64], strides = [1, 1]} : vector<8x256xf32> to vector<8x64xf32>
    %191 = arith.negf %190 : vector<8x64xf32>
    %192 = math.exp %191 : vector<8x64xf32>
    %cst_39 = arith.constant 1.000000e+00 : f32
    %193 = vector.broadcast %cst_39 : f32 to vector<8x64xf32>
    %194 = arith.addf %193, %192 : vector<8x64xf32>
    %195 = arith.divf %193, %194 : vector<8x64xf32>
    %196 = vector.extract_strided_slice %189 {offsets = [0, 64], sizes = [8, 64], strides = [1, 1]} : vector<8x256xf32> to vector<8x64xf32>
    %197 = arith.negf %196 : vector<8x64xf32>
    %198 = math.exp %197 : vector<8x64xf32>
    %cst_40 = arith.constant 1.000000e+00 : f32
    %199 = vector.broadcast %cst_40 : f32 to vector<8x64xf32>
    %200 = arith.addf %199, %198 : vector<8x64xf32>
    %201 = arith.divf %199, %200 : vector<8x64xf32>
    %202 = vector.extract_strided_slice %189 {offsets = [0, 128], sizes = [8, 64], strides = [1, 1]} : vector<8x256xf32> to vector<8x64xf32>
    %203 = math.tanh %202 : vector<8x64xf32>
    %204 = vector.extract_strided_slice %189 {offsets = [0, 192], sizes = [8, 64], strides = [1, 1]} : vector<8x256xf32> to vector<8x64xf32>
    %205 = arith.negf %204 : vector<8x64xf32>
    %206 = math.exp %205 : vector<8x64xf32>
    %cst_41 = arith.constant 1.000000e+00 : f32
    %207 = vector.broadcast %cst_41 : f32 to vector<8x64xf32>
    %208 = arith.addf %207, %206 : vector<8x64xf32>
    %209 = arith.divf %207, %208 : vector<8x64xf32>
    %210 = arith.mulf %201, %155 : vector<8x64xf32>
    %211 = arith.mulf %195, %203 : vector<8x64xf32>
    %212 = arith.addf %210, %211 : vector<8x64xf32>
    %213 = math.tanh %212 : vector<8x64xf32>
    %214 = arith.mulf %209, %213 : vector<8x64xf32>
    %215 = tpu.concatenate %214, %187 in 1 : vector<8x64xf32>, vector<8x64xf32> -> vector<8x128xf32>
    %cst_42 = arith.constant dense<0.000000e+00> : vector<8x512xf32>
    %216 = tpu.matmul %215, %9, %cst_42 {dimension_numbers = #tpu.dot_dimension_numbers<[1], [0], [0], [1], [0, 0, 1, 1], [], []>} : vector<8x128xf32>, vector<128x512xf32>, vector<8x512xf32> -> vector<8x512xf32>
    %217 = vector.extract_strided_slice %216 {offsets = [0, 0], sizes = [8, 256], strides = [1, 1]} : vector<8x512xf32> to vector<8x256xf32>
    %218 = vector.extract_strided_slice %216 {offsets = [0, 256], sizes = [8, 256], strides = [1, 1]} : vector<8x512xf32> to vector<8x256xf32>
    %219 = arith.addf %218, %12 : vector<8x256xf32>
    %220 = vector.extract_strided_slice %219 {offsets = [0, 0], sizes = [8, 64], strides = [1, 1]} : vector<8x256xf32> to vector<8x64xf32>
    %221 = arith.negf %220 : vector<8x64xf32>
    %222 = math.exp %221 : vector<8x64xf32>
    %cst_43 = arith.constant 1.000000e+00 : f32
    %223 = vector.broadcast %cst_43 : f32 to vector<8x64xf32>
    %224 = arith.addf %223, %222 : vector<8x64xf32>
    %225 = arith.divf %223, %224 : vector<8x64xf32>
    %226 = vector.extract_strided_slice %219 {offsets = [0, 64], sizes = [8, 64], strides = [1, 1]} : vector<8x256xf32> to vector<8x64xf32>
    %227 = arith.negf %226 : vector<8x64xf32>
    %228 = math.exp %227 : vector<8x64xf32>
    %cst_44 = arith.constant 1.000000e+00 : f32
    %229 = vector.broadcast %cst_44 : f32 to vector<8x64xf32>
    %230 = arith.addf %229, %228 : vector<8x64xf32>
    %231 = arith.divf %229, %230 : vector<8x64xf32>
    %232 = vector.extract_strided_slice %219 {offsets = [0, 128], sizes = [8, 64], strides = [1, 1]} : vector<8x256xf32> to vector<8x64xf32>
    %233 = math.tanh %232 : vector<8x64xf32>
    %234 = vector.extract_strided_slice %219 {offsets = [0, 192], sizes = [8, 64], strides = [1, 1]} : vector<8x256xf32> to vector<8x64xf32>
    %235 = arith.negf %234 : vector<8x64xf32>
    %236 = math.exp %235 : vector<8x64xf32>
    %cst_45 = arith.constant 1.000000e+00 : f32
    %237 = vector.broadcast %cst_45 : f32 to vector<8x64xf32>
    %238 = arith.addf %237, %236 : vector<8x64xf32>
    %239 = arith.divf %237, %238 : vector<8x64xf32>
    %240 = arith.mulf %231, %185 : vector<8x64xf32>
    %241 = arith.mulf %225, %233 : vector<8x64xf32>
    %242 = arith.addf %240, %241 : vector<8x64xf32>
    %243 = math.tanh %242 : vector<8x64xf32>
    %244 = arith.mulf %239, %243 : vector<8x64xf32>
    %c0_46 = arith.constant 0 : index
    %c0_47 = arith.constant 0 : index
    %245 = vector.load %arg13[%c0_46, %c0_47] : memref<8x64xf32, #tpu.memory_space<vmem>>, vector<8x64xf32>
    tpu.vector_store %arg13[%c0_46, %c0_47], %214 {strides = array<i32>} : memref<8x64xf32, #tpu.memory_space<vmem>>, vector<8x64xf32>,
    %c0_48 = arith.constant 0 : index
    %c0_49 = arith.constant 0 : index
    %246 = vector.load %arg14[%c0_48, %c0_49] : memref<8x64xf32, #tpu.memory_space<vmem>>, vector<8x64xf32>
    tpu.vector_store %arg14[%c0_48, %c0_49], %212 {strides = array<i32>} : memref<8x64xf32, #tpu.memory_space<vmem>>, vector<8x64xf32>,
    %c0_50 = arith.constant 0 : index
    %c0_51 = arith.constant 0 : index
    %247 = vector.load %arg15[%c0_50, %c0_51] : memref<8x64xf32, #tpu.memory_space<vmem>>, vector<8x64xf32>
    tpu.vector_store %arg15[%c0_50, %c0_51], %244 {strides = array<i32>} : memref<8x64xf32, #tpu.memory_space<vmem>>, vector<8x64xf32>,
    %c0_52 = arith.constant 0 : index
    %c0_53 = arith.constant 0 : index
    %248 = vector.load %arg16[%c0_52, %c0_53] : memref<8x64xf32, #tpu.memory_space<vmem>>, vector<8x64xf32>
    tpu.vector_store %arg16[%c0_52, %c0_53], %242 {strides = array<i32>} : memref<8x64xf32, #tpu.memory_space<vmem>>, vector<8x64xf32>,
    %c0_54 = arith.constant 0 : index
    %c0_55 = arith.constant 0 : index
    %249 = vector.load %arg17[%c0_54, %c0_55] : memref<8x256xf32, #tpu.memory_space<vmem>>, vector<8x256xf32>
    tpu.vector_store %arg17[%c0_54, %c0_55], %217 {strides = array<i32>} : memref<8x256xf32, #tpu.memory_space<vmem>>, vector<8x256xf32>,
    %c1_i32 = arith.constant 1 : i32
    %250 = arith.cmpi eq, %arg0, %c1_i32 : i32
    %251 = arith.extui %250 : i1 to i32
    %c0_i32_56 = arith.constant 0 : i32
    %252 = arith.cmpi ne, %251, %c0_i32_56 : i32
    scf.if %252 {
      %c0_57 = arith.constant 0 : index
      %c0_58 = arith.constant 0 : index
      %253 = vector.load %arg6[%c0_57, %c0_58] : memref<64x128xf32, #tpu.memory_space<vmem>>, vector<64x128xf32>
      %cst_59 = arith.constant dense<0.000000e+00> : vector<8x128xf32>
      %254 = tpu.matmul %244, %253, %cst_59 {dimension_numbers = #tpu.dot_dimension_numbers<[1], [0], [0], [1], [0, 0, 1, 1], [], []>} : vector<8x64xf32>, vector<64x128xf32>, vector<8x128xf32> -> vector<8x128xf32>
      %c0_60 = arith.constant 0 : index
      %c0_61 = arith.constant 0 : index
      %255 = vector.load %arg7[%c0_60, %c0_61] : memref<1x128xf32, #tpu.memory_space<vmem>>, vector<1x128xf32>
      %256 = vector.broadcast %255 : vector<1x128xf32> to vector<8x128xf32>
      %257 = arith.addf %254, %256 : vector<8x128xf32>
      %cst_62 = arith.constant 0.000000e+00 : f32
      %258 = vector.broadcast %cst_62 : f32 to vector<8x128xf32>
      %259 = arith.maximumf %257, %258 : vector<8x128xf32>
      %c0_63 = arith.constant 0 : index
      %c0_64 = arith.constant 0 : index
      %260 = vector.load %arg8[%c0_63, %c0_64] : memref<128x128xf32, #tpu.memory_space<vmem>>, vector<128x128xf32>
      %cst_65 = arith.constant dense<0.000000e+00> : vector<8x128xf32>
      %261 = tpu.matmul %259, %260, %cst_65 {dimension_numbers = #tpu.dot_dimension_numbers<[1], [0], [0], [1], [0, 0, 1, 1], [], []>} : vector<8x128xf32>, vector<128x128xf32>, vector<8x128xf32> -> vector<8x128xf32>
      %c0_66 = arith.constant 0 : index
      %c0_67 = arith.constant 0 : index
      %262 = vector.load %arg9[%c0_66, %c0_67] : memref<1x128xf32, #tpu.memory_space<vmem>>, vector<1x128xf32>
      %263 = vector.broadcast %262 : vector<1x128xf32> to vector<8x128xf32>
      %264 = arith.addf %261, %263 : vector<8x128xf32>
      %cst_68 = arith.constant 0.000000e+00 : f32
      %265 = vector.broadcast %cst_68 : f32 to vector<8x128xf32>
      %266 = arith.maximumf %264, %265 : vector<8x128xf32>
      %c0_69 = arith.constant 0 : index
      %c0_70 = arith.constant 0 : index
      %267 = vector.load %arg10[%c0_69, %c0_70] : memref<128x128xf32, #tpu.memory_space<vmem>>, vector<128x128xf32>
      %cst_71 = arith.constant dense<0.000000e+00> : vector<8x128xf32>
      %268 = tpu.matmul %266, %267, %cst_71 {dimension_numbers = #tpu.dot_dimension_numbers<[1], [0], [0], [1], [0, 0, 1, 1], [], []>} : vector<8x128xf32>, vector<128x128xf32>, vector<8x128xf32> -> vector<8x128xf32>
      %c0_72 = arith.constant 0 : index
      %c0_73 = arith.constant 0 : index
      %269 = vector.load %arg11[%c0_72, %c0_73] : memref<1x128xf32, #tpu.memory_space<vmem>>, vector<1x128xf32>
      %270 = vector.broadcast %269 : vector<1x128xf32> to vector<8x128xf32>
      %271 = arith.addf %268, %270 : vector<8x128xf32>
      %272 = arith.negf %271 : vector<8x128xf32>
      %273 = math.exp %272 : vector<8x128xf32>
      %cst_74 = arith.constant 1.000000e+00 : f32
      %274 = vector.broadcast %cst_74 : f32 to vector<8x128xf32>
      %275 = arith.addf %274, %273 : vector<8x128xf32>
      %276 = arith.divf %274, %275 : vector<8x128xf32>
      %c0_75 = arith.constant 0 : index
      %c0_76 = arith.constant 0 : index
      %277 = vector.load %arg12[%c0_75, %c0_76] : memref<8x128xf32, #tpu.memory_space<vmem>>, vector<8x128xf32>
      tpu.vector_store %arg12[%c0_75, %c0_76], %276 {strides = array<i32>} : memref<8x128xf32, #tpu.memory_space<vmem>>, vector<8x128xf32>,
    } else {
    }
    return
  }
  func.func @transform_0(%arg0: i32) -> (i32, i32) {
    %c0_i32 = arith.constant 0 : i32
    %c0_i32_0 = arith.constant 0 : i32
    return %arg0, %c0_i32 : i32, i32
  }
  func.func @transform_1(%arg0: i32) -> (i32, i32) {
    %c0_i32 = arith.constant 0 : i32
    %c0_i32_0 = arith.constant 0 : i32
    %c0_i32_1 = arith.constant 0 : i32
    return %c0_i32, %c0_i32_0 : i32, i32
  }
  func.func @transform_2(%arg0: i32) -> (i32, i32) {
    %c0_i32 = arith.constant 0 : i32
    %c0_i32_0 = arith.constant 0 : i32
    %c0_i32_1 = arith.constant 0 : i32
    return %c0_i32, %c0_i32_0 : i32, i32
  }
  func.func @transform_3(%arg0: i32) -> (i32, i32) {
    %c0_i32 = arith.constant 0 : i32
    %c0_i32_0 = arith.constant 0 : i32
    %c0_i32_1 = arith.constant 0 : i32
    return %c0_i32, %c0_i32_0 : i32, i32
  }
  func.func @transform_4(%arg0: i32) -> (i32, i32) {
    %c0_i32 = arith.constant 0 : i32
    %c0_i32_0 = arith.constant 0 : i32
    %c0_i32_1 = arith.constant 0 : i32
    return %c0_i32, %c0_i32_0 : i32, i32
  }
  func.func @transform_5(%arg0: i32) -> (i32, i32) {
    %c0_i32 = arith.constant 0 : i32
    %c0_i32_0 = arith.constant 0 : i32
    %c0_i32_1 = arith.constant 0 : i32
    return %c0_i32, %c0_i32_0 : i32, i32
  }
  func.func @transform_6(%arg0: i32) -> (i32, i32) {
    %c0_i32 = arith.constant 0 : i32
    %c0_i32_0 = arith.constant 0 : i32
    %c0_i32_1 = arith.constant 0 : i32
    return %c0_i32, %c0_i32_0 : i32, i32
  }
  func.func @transform_7(%arg0: i32) -> (i32, i32) {
    %c0_i32 = arith.constant 0 : i32
    %c0_i32_0 = arith.constant 0 : i32
    %c0_i32_1 = arith.constant 0 : i32
    return %c0_i32, %c0_i32_0 : i32, i32
  }
  func.func @transform_8(%arg0: i32) -> (i32, i32) {
    %c0_i32 = arith.constant 0 : i32
    %c0_i32_0 = arith.constant 0 : i32
    %c0_i32_1 = arith.constant 0 : i32
    return %c0_i32, %c0_i32_0 : i32, i32
  }
  func.func @transform_9(%arg0: i32) -> (i32, i32) {
    %c0_i32 = arith.constant 0 : i32
    %c0_i32_0 = arith.constant 0 : i32
    %c0_i32_1 = arith.constant 0 : i32
    return %c0_i32, %c0_i32_0 : i32, i32
  }
  func.func @transform_10(%arg0: i32) -> (i32, i32) {
    %c0_i32 = arith.constant 0 : i32
    %c0_i32_0 = arith.constant 0 : i32
    %c0_i32_1 = arith.constant 0 : i32
    return %c0_i32, %c0_i32_0 : i32, i32
  }
  func.func @transform_11(%arg0: i32) -> (i32, i32) {
    %c0_i32 = arith.constant 0 : i32
    %c0_i32_0 = arith.constant 0 : i32
    %c0_i32_1 = arith.constant 0 : i32
    return %c0_i32, %c0_i32_0 : i32, i32
  }
}

</mosaic_0001>

<bundles_post_ra>
// kernel: tpu_custom_call.1
= control target key start
LH: loop header
LB: loop body
LE: loop exit
PB: predicated region body
PF: predicated region fallthrough
CT: control target
= control target key end

     0   :  { %s3598_s0 = inlined_call_operand.hbm [shape: f32[64,128], index: 0, kind: input, shape index: {}]   ;;  %s3599_s1 = inlined_call_operand.hbm [shape: f32[128,256], index: 1, kind: input, shape index: {}]   ;;  %s3600_s2 = inlined_call_operand.vmem [shape: f32[1,256], index: 2, kind: input, shape index: {}]   ;;  %s3601_s3 = inlined_call_operand.hbm [shape: f32[128,512], index: 3, kind: input, shape index: {}]   ;;  %s3602_s4 = inlined_call_operand.vmem [shape: f32[1,256], index: 4, kind: input, shape index: {}]   ;;  %s3603_s5 = inlined_call_operand.hbm [shape: f32[64,128], index: 5, kind: input, shape index: {}]   ;;  %s3604_s6 = inlined_call_operand.vmem [shape: f32[1,128], index: 6, kind: input, shape index: {}]   ;;  %s3605_s7 = inlined_call_operand.hbm [shape: f32[128,128], index: 7, kind: input, shape index: {}]   ;;  %s3606_s8 = inlined_call_operand.vmem [shape: f32[1,128], index: 8, kind: input, shape index: {}]   ;;  %s3607_s9 = inlined_call_operand.hbm [shape: f32[128,128], index: 9, kind: input, shape index: {}]   ;;  %s3608_s10 = inlined_call_operand.vmem [shape: f32[1,128], index: 10, kind: input, shape index: {}]   ;;  %s3609_s11 = inlined_call_operand.hbm [shape: f32[8,128], index: 11, kind: output, shape index: {}]  }
   0x1   :  { %3617 = sst [smem:[#allocation24_spill]] %s3599_s1 }
   0x2   :  { %3618 = sst [smem:[#allocation25_spill]] %s3603_s5 }
   0x3   :  { %3619 = sst [smem:[#allocation26_spill]] %s3606_s8 }
   0x4   :  { %3620 = sst [smem:[#allocation27_spill]] %s3608_s10 }
   0x5   :  { %3621 = sst [smem:[#allocation28_spill]] %s3609_s11 }
   0x6   :  { %16 = vsyncpa [#allocation8], 0 }
   0x7   :  { %18 = vsyncpa [#allocation8 + $0x1], 0 }
   0x8   :  { %19 = vsyncpa [#allocation11], 0 }
   0x9   :  { %20 = vsyncpa [#allocation14], 0 }
   0xa   :  { %21 = vsyncpa [#allocation17], 0 }
   0xb   :  { %22 = vsyncpa [#allocation9], 0  ;;  %s2977_s17 = smov 0   ;;  %s2979_s18 = smov 0  }
   0xc   :  { %s2981_s19 = smov 0   ;;  %s2983_s20 = smov 0  }
   0xd LB: > { %s2898_s21 = smov [#allocation10]   ;;  %s2998_s23 = sadd.s32 4294967295, %s2896_s20   ;;  %s2896_s20 = sphi %s2983_s20, %s3646_s20   ;;  %s2892_s19 = sphi %s2981_s19, %s3645_s19   ;;  %s2888_s18 = sphi %s2979_s18, %s3644_s18   ;;  %s2884_s17 = sphi %s2977_s17, %s3643_s17  }
   0xe   : > { %s302_s22 = sshll.u32 %s2898_s21, 4  ;;  %p1899_p0 = scmp.ge.s32.totalorder %s2896_s20, 1  ;;  %s3004_s22 = int_to_ptr.vmem [resolvable:$true] %s302_s22 }
   0xf   : > { %p3611_p1 = scmp.eq.s32.totalorder %s2998_s23, 0  ;;  %p290_p2 = scmp.lt.s32.totalorder %s2896_s20, 3 }
  0x10   : > { %s2899_s25 = smov [#allocation13]   ;;  %s2900_s28 = smov [#allocation12]  }
  0x11   : > { %p3006_p4 = pnand %p1899_p0, %p290_p2  ;;  %s334_s26 = sshll.u32 %s2899_s25, 4  ;;  %s3018_s26 = int_to_ptr.vmem [resolvable:$true] %s334_s26 }
  0x12   : > { %s3020_s29 = sshll.u32 %s2900_s28, 4  ;;  %s3624_s1 = sld [smem:[#allocation24_spill]]  ;;  %s319_s29 = int_to_ptr.vmem [resolvable:$true] %s3020_s29 }
  0x13   : > { %s3622_s24 = scalar_select %p3006_p4, 1, 0 }
  0x14   : > { %p2462_p5 = pneg %p3006_p4 }
  0x16   : > { %p3014_p6 = pnand %p2462_p5, %p3611_p1 }
  0x18   : > { %s2650_s13 = scalar_lea.hbm %s3624_s1, 4096  ;;  %p3030_p8 = pneg %p3014_p6 }
  0x19   : > { %p2651_p7 = scmp.ne.s32.totalorder %s3624_s1, %s2650_s13  ;;  %p2657_p11 = scmp.lt.u32.totalorder %s2650_s13, %s3624_s1 }
  0x1b   : > { %p2653_p9 = pnand %p3030_p8, %p2651_p7 }
  0x1d   : > { %p2654_p10 = pneg %p2653_p9 }
  0x1f   : > { %p2659_p12 = pnand %p2657_p11, %p2654_p10 }
  0x21   : > { %2662 = shalt.err (!%p2659_p12)
}
  0x22   : > { %s2663_s28 = scalar_lea.vmem %s3004_s22, 4096  ;;  %p2671_p5 = scmp.lt.s32.totalorder %s3004_s22, %s3004_s22 }
  0x23   : > { %p2664_p13 = scmp.ne.s32.totalorder %s3004_s22, %s2663_s28  ;;  %p2672_p3 = scmp.lt.s32.totalorder %s2663_s28, %s2663_s28 }
  0x25   : > { %p2666_p0 = pnand %p2664_p13, %p3030_p8  ;;  %p2673_p7 = por %p2672_p3, %p2671_p5 }
  0x27   : > { %p2667_p2 = pneg %p2666_p0 }
  0x29   : > { %p2674_p9 = pnand %p2673_p7, %p2667_p2 }
  0x2b   : > { %2677 = shalt.err (!%p2674_p9)
}
  0x2c   : > { %s2901_s30 = smov 256   ;;  %s2902_s12 = smov 16  }
  0x2d   : > { %2465 = dma.hbm_to_vmem [thread:$0]  (!%p3014_p6), %s3624_s1, 4096, %s3004_s22, [#allocation11], %s2901_s30, %s2901_s30, %s2902_s12  }
  0x2e   : > { %s3626_s5 = sld [smem:[#allocation25_spill]] }
  0x34   : > { %s2678_s25 = scalar_lea.hbm %s3626_s5, 1024 }
  0x35   : > { %p2679_p3 = scmp.ne.s32.totalorder %s3626_s5, %s2678_s25  ;;  %p2685_p12 = scmp.lt.u32.totalorder %s2678_s25, %s3626_s5 }
  0x37   : > { %p2681_p10 = pnand %p2679_p3, %p3030_p8 }
  0x39   : > { %p2682_p11 = pneg %p2681_p10 }
  0x3b   : > { %p2687_p13 = pnand %p2685_p12, %p2682_p11 }
  0x3d   : > { %2690 = shalt.err (!%p2687_p13)
}
  0x3e   : > { %s2691_s22 = scalar_lea.vmem %s3018_s26, 1024  ;;  %p2699_p7 = scmp.lt.s32.totalorder %s3018_s26, %s3018_s26 }
  0x3f   : > { %p2692_p0 = scmp.ne.s32.totalorder %s3018_s26, %s2691_s22  ;;  %p2700_p9 = scmp.lt.s32.totalorder %s2691_s22, %s2691_s22 }
  0x41   : > { %p2694_p2 = pnand %p2692_p0, %p3030_p8  ;;  %p2701_p3 = por %p2700_p9, %p2699_p7 }
  0x43   : > { %p2695_p5 = pneg %p2694_p2 }
  0x45   : > { %p2702_p10 = pnand %p2701_p3, %p2695_p5 }
  0x47   : > { %2705 = shalt.err (!%p2702_p10)
}
  0x48   : > { %s3613_s10 = smov 128   ;;  %s3615_s8 = smov 8  }
  0x49   : > { %2471 = dma.hbm_to_vmem [thread:$0]  (!%p3014_p6), %s3626_s5, 1024, %s3018_s26, [#allocation14], %s3613_s10, %s3613_s10, %s3615_s8  }
  0x4a   : > { %s2706_s14 = scalar_lea.hbm %s3601_s3, 8192 }
  0x4b   : > { %p2707_p11 = scmp.ne.s32.totalorder %s3601_s3, %s2706_s14  ;;  %p2713_p0 = scmp.lt.u32.totalorder %s2706_s14, %s3601_s3 }
  0x4d   : > { %p2709_p12 = pnand %p2707_p11, %p3030_p8 }
  0x4f   : > { %p2710_p13 = pneg %p2709_p12 }
  0x51   : > { %p2715_p2 = pnand %p2713_p0, %p2710_p13 }
  0x53   : > { %2718 = shalt.err (!%p2715_p2)
}
  0x54   : > { %s2719_s22 = scalar_lea.vmem %s319_s29, 8192  ;;  %p2727_p3 = scmp.lt.s32.totalorder %s319_s29, %s319_s29 }
  0x55   : > { %p2720_p5 = scmp.ne.s32.totalorder %s319_s29, %s2719_s22  ;;  %p2728_p10 = scmp.lt.s32.totalorder %s2719_s22, %s2719_s22 }
  0x57   : > { %p2722_p7 = pnand %p2720_p5, %p3030_p8  ;;  %p2729_p1 = por %p2728_p10, %p2727_p3 }
  0x59   : > { %p2723_p9 = pneg %p2722_p7 }
  0x5b   : > { %p2730_p4 = pnand %p2729_p1, %p2723_p9 }
  0x5d   : > { %2733 = shalt.err (!%p2730_p4)
}
  0x5e   : > { %s2905_s26 = smov 512   ;;  %s2906_s11 = smov 32  }
  0x5f   : > { %2468 = dma.hbm_to_vmem [thread:$0]  (!%p3014_p6), %s3601_s3, 8192, %s319_s29, [#allocation11], %s2905_s26, %s2905_s26, %s2906_s11  }
  0x60   : > { %s2907_s13 = smov [#allocation15]   ;;  %s2908_s15 = smov [#allocation16]  }
  0x61   : > { %s350_s14 = sshll.u32 %s2907_s13, 4  ;;  %s366_s21 = sshll.u32 %s2908_s15, 4  ;;  %s351_s14 = int_to_ptr.vmem [resolvable:$true] %s350_s14  ;;  %s367_s21 = int_to_ptr.vmem [resolvable:$true] %s366_s21 }
  0x62   : > { %s2734_s22 = scalar_lea.hbm %s3605_s7, 2048 }
  0x63   : > { %p2735_p1 = scmp.ne.s32.totalorder %s3605_s7, %s2734_s22  ;;  %p2741_p12 = scmp.lt.u32.totalorder %s2734_s22, %s3605_s7 }
  0x65   : > { %p2737_p4 = pnand %p2735_p1, %p3030_p8 }
  0x67   : > { %p2738_p11 = pneg %p2737_p4 }
  0x69   : > { %p2743_p13 = pnand %p2741_p12, %p2738_p11 }
  0x6b   : > { %2746 = shalt.err (!%p2743_p13)
}
  0x6c   : > { %s2747_s29 = scalar_lea.vmem %s351_s14, 2048  ;;  %p2755_p7 = scmp.lt.s32.totalorder %s351_s14, %s351_s14 }
  0x6d   : > { %p2748_p0 = scmp.ne.s32.totalorder %s351_s14, %s2747_s29  ;;  %p2756_p9 = scmp.lt.s32.totalorder %s2747_s29, %s2747_s29 }
  0x6f   : > { %p2750_p2 = pnand %p2748_p0, %p3030_p8  ;;  %p2757_p3 = por %p2756_p9, %p2755_p7 }
  0x71   : > { %p2751_p5 = pneg %p2750_p2 }
  0x73   : > { %p2758_p10 = pnand %p2757_p3, %p2751_p5 }
  0x75   : > { %2761 = shalt.err (!%p2758_p10)
}
  0x76   : > { %s3627_s10 = smov 8   ;;  %s3628_s8 = smov 128  }
  0x77   : > { %2474 = dma.hbm_to_vmem [thread:$0]  (!%p3014_p6), %s3605_s7, 2048, %s351_s14, [#allocation14], %s3628_s8, %s3628_s8, %s3627_s10  }
  0x78   : > { %s2762_s30 = scalar_lea.hbm %s3607_s9, 2048 }
  0x79   : > { %p2763_p1 = scmp.ne.s32.totalorder %s3607_s9, %s2762_s30  ;;  %p2769_p12 = scmp.lt.u32.totalorder %s2762_s30, %s3607_s9 }
  0x7b   : > { %p2765_p4 = pnand %p2763_p1, %p3030_p8 }
  0x7d   : > { %p2766_p11 = pneg %p2765_p4 }
  0x7f   : > { %p2771_p13 = pnand %p2769_p12, %p2766_p11 }
  0x81   : > { %2774 = shalt.err (!%p2771_p13)
}
  0x82   : > { %s2775_s28 = scalar_lea.vmem %s367_s21, 2048  ;;  %p2783_p7 = scmp.lt.s32.totalorder %s367_s21, %s367_s21 }
  0x83   : > { %p2776_p0 = scmp.ne.s32.totalorder %s367_s21, %s2775_s28  ;;  %p2784_p9 = scmp.lt.s32.totalorder %s2775_s28, %s2775_s28 }
  0x85   : > { %p2778_p2 = pnand %p2776_p0, %p3030_p8  ;;  %p2785_p3 = por %p2784_p9, %p2783_p7 }
  0x87   : > { %p2779_p5 = pneg %p2778_p2 }
  0x89   : > { %p2786_p10 = pnand %p2785_p3, %p2779_p5 }
  0x8b   : > { %2789 = shalt.err (!%p2786_p10)
}
  0x8c   : > { %2477 = dma.hbm_to_vmem [thread:$0]  (!%p3014_p6), %s3607_s9, 2048, %s367_s21, [#allocation17], %s3628_s8, %s3628_s8, %s3627_s10  }
  0x8d   : > { %s3139_s27 = sadd.s32 1, %s2896_s20   ;;  %s35_s29 = sadd.s32 1, %s2892_s19 }
  0x8e   : > { %s32_s16 = ssub.s32 %s2896_s20, %s3139_s27  ;;  %p42_p1 = scmp.ne.s32.totalorder %s2892_s19, %s2888_s18 }
  0x8f   : > { %p33_p8 = scmp.eq.s32.totalorder %s32_s16, 0  ;;  %p43_p4 = scmp.eq.s32.totalorder %s2896_s20, 0 }
  0x90   : > { %p48_p11 = scmp.ne.s32.totalorder %s2888_s18, %s2884_s17  ;;  %p3629_p13 = scmp.eq.s32.totalorder %s2998_s23, 0 }
  0x91   : > { %s3150_s1 = scalar_select %p33_p8, %s2892_s19, %s35_s29  }
  0x92   : > { %p44_p12 = por %p43_p4, %p42_p1  ;;  %p3154_p0 = por %p3629_p13, %p48_p11 }
  0x93   : > { %p2487_p2 = scmp.lt.s32.totalorder %s2896_s20, 2  ;;  %s383_s26 = sand.u32 1, %s2892_s19  }
  0x94   : > { %s1906_s21 = sshll.u32 %s383_s26, 5  ;;  %s1943_s11 = sshll.u32 %s2896_s20, 9 }
  0x95   : > { %s3164_s13 = scalar_lea.hbm %s3598_s0, %s1943_s11  ;;  %s387_s17 = scalar_lea.vmem [#allocation7], %s1906_s21 }
  0x96   : > { %s394_s15 = sshll.u32 %s387_s17, 4  ;;  %p3168_p6 = pnand %p2487_p2, %p44_p12  ;;  %s3166_s15 = int_to_ptr.vmem [resolvable:$true] %s394_s15 }
  0x97   : > { %s3172_s20 = scalar_lea.sflag [#allocation8], %s383_s26  ;;  %s2790_s28 = scalar_lea.hbm %s3164_s13, 512 }
  0x98   : > { %p2791_p5 = scmp.ne.s32.totalorder %s3164_s13, %s2790_s28  ;;  %p2792_p7 = pneg %p3168_p6 }
  0x99   : > { %s2795_s16 = scalar_lea.hbm %s3598_s0, 1024  ;;  %p2796_p10 = scmp.lt.u32.totalorder %s3164_s13, %s3598_s0 }
  0x9a   : > { %p2793_p9 = pnand %p2792_p7, %p2791_p5  ;;  %p2797_p8 = scmp.lt.u32.totalorder %s2795_s16, %s2790_s28 }
  0x9b   : > { %p2799_p4 = scmp.lt.u32.totalorder %s2790_s28, %s3164_s13 }
  0x9c   : > { %p2794_p3 = pneg %p2793_p9  ;;  %p2798_p1 = por %p2797_p8, %p2796_p10 }
  0x9e   : > { %p2800_p11 = por %p2799_p4, %p2798_p1 }
  0xa0   : > { %p2801_p12 = pnand %p2800_p11, %p2794_p3 }
  0xa2   : > { %2804 = shalt.err (!%p2801_p12)
}
  0xa3   : > { %s2805_s26 = scalar_lea.vmem %s3166_s15, 512  ;;  %s2909_s11 = smov [#allocation7]  }
  0xa4   : > { %p2806_p13 = scmp.ne.s32.totalorder %s3166_s15, %s2805_s26  ;;  %s2810_s30 = sshll.u32 %s2909_s11, 4  ;;  %s2811_s30 = int_to_ptr.vmem [resolvable:$false] %s2810_s30 }
  0xa5   : > { %s2812_s12 = scalar_lea.vmem %s2811_s30, 1024  ;;  %p2813_p9 = scmp.lt.s32.totalorder %s3166_s15, %s2811_s30 }
  0xa6   : > { %p2808_p2 = pnand %p2806_p13, %p2792_p7  ;;  %p2814_p10 = scmp.lt.s32.totalorder %s2812_s12, %s2805_s26 }
  0xa8   : > { %p2809_p5 = pneg %p2808_p2  ;;  %p2815_p8 = por %p2814_p10, %p2813_p9 }
  0xaa   : > { %p2816_p1 = pnand %p2815_p8, %p2809_p5 }
  0xac   : > { %2819 = shalt.err (!%p2816_p1)
}
  0xad   : > { %2481 = dma.hbm_to_vmem [thread:$0]  (!%p3168_p6), %s3164_s13, 512, %s3166_s15, %s3172_s20, %s3628_s8, %s3628_s8, %s3627_s10  }
  0xae   : > { %p3632_p7 = scmp.ne.s32.totalorder %s3622_s24, 0 }
  0xaf   : > { %s408_s17 = sand.u32 (!%p3632_p7), 1, %s2888_s18  }
  0xb0   : > { %406 = sbr.rel (%p3632_p7) target bundleno = 3386 (0xd3a), region = 64  ;;  %s1910_s28 = sshll.u32 (!%p3632_p7), %s408_s17, 5 }
  0xb1   : > { %s409_s14 = scalar_lea.sflag (!%p3632_p7), [#allocation8], %s408_s17  ;;  %s3206_s22 = scalar_lea.vmem (!%p3632_p7), [#allocation7], %s1910_s28 }
  0xb7   : > { %2863 = dma.done.wait (%p3154_p0), %s409_s14, 512  }
  0xb8   : > { %2865 = vsyncadd (%p3154_p0), %s409_s14, 4294966784  ;;  %p3633_p3 = scmp.eq.s32.totalorder %s2998_s23, 0 }
  0xba   : > { %2867 = dma.done.wait (%p3633_p3), [#allocation11], 12288   ;;  %p3634_p6 = pmov %p3633_p3 }
  0xbb   : > { %p3635_p4 = pmov %p3633_p3 }
  0xbc   : > { %2869 = vsyncadd (%p3634_p6), [#allocation11], 4294955008 }
  0xbd   : > { %2871 = dma.done.wait (%p3635_p4), [#allocation14], 3072   ;;  %p3636_p11 = pmov %p3633_p3 }
  0xbe   : > { %p3637_p12 = pmov %p3633_p3 }
  0xbf   : > { %2873 = vsyncadd (%p3636_p11), [#allocation14], 4294964224 }
  0xc0   : > { %2875 = dma.done.wait (%p3637_p12), [#allocation17], 2048   ;;  %p3638_p13 = pmov %p3633_p3 }
  0xc1   : > { %p3639_p0 = scmp.ne.s32.totalorder %s2998_s23, 0 }
  0xc2   : > { %2877 = vsyncadd (%p3638_p13), [#allocation17], 4294965248  ;;  %vm471_vm0 = vcmask (!%p3639_p0), 523264   ;;  %v2910_v0 = vmov (!%p3639_p0), 0.0  }
  0xc3   : > { %470 = sbr.rel (%p3639_p0) target bundleno = 202 (0xca), region = 92  ;;  %473 = vst.msk [vmem:[#allocation3] sm:$0xff] (!%p3639_p0), %vm471_vm0, %v2910_v0  ;;  %474 = vst.msk [vmem:[#allocation4] sm:$0xff] (!%p3639_p0), %vm471_vm0, %v2910_v0 }
  0xc4   : > { %475 = vst.msk [vmem:[#allocation5] sm:$0xff] (!%p3639_p0), %vm471_vm0, %v2910_v0  ;;  %476 = vst [vmem:[#allocation6] sm:$0xff] (!%p3639_p0), %v2910_v0 }
  0xc5   : > { %477 = vst [vmem:[#allocation6 + $0x8] sm:$0xff] (!%p3639_p0), %v2910_v0 }
  0xca PF: > { %v483_v1 = vld [vmem:[#allocation10 + $0x8] sm:$0xff]  ;;  %v485_v2 = vld [vmem:[#allocation10 + $0x18] sm:$0xff]  ;;  %v482_v3 = vld [vmem:[#allocation10] sm:$0xff]  ;;  %v2911_v8 = vmov 0.0   ;;  %s2912_s24 = smov 64   ;;  %v516_v52 = vlaneseq  ;;  %vm732_vm1 = vcmask 523264  }
  0xcb   : > { %v2076_v4 = vpack.c.bf16 %v485_v2, %v483_v1  ;;  %v484_v5 = vld [vmem:[#allocation10 + $0x10] sm:$0xff]  ;;  %v487_v6 = vld [vmem:[#allocation10 + $0x28] sm:$0xff]  ;;  %v489_v7 = vld [vmem:[#allocation10 + $0x38] sm:$0xff]  ;;  %590 = vmatprep.mubr.f32.mxu0 %v2911_v8  ;;  %869 = vmatprep.mubr.f32.mxu1 %v2911_v8  ;;  %p1933_p2 = scmp.ne.s32.totalorder %s2998_s23, 1 }
  0xcc   : > { %v2078_v9 = vpack.c.bf16 %v484_v5, %v482_v3  ;;  %v2080_v10 = vpack.c.bf16 %v489_v7, %v487_v6  ;;  %v486_v11 = vld [vmem:[#allocation10 + $0x20] sm:$0xff]  ;;  %v488_v12 = vld [vmem:[#allocation10 + $0x30] sm:$0xff]  ;;  %v491_v13 = vld [vmem:[#allocation10 + $0x48] sm:$0xff]  ;;  %v3231_v53 = vshrl.u32 %v516_v52, 7  ;;  %vm2914_vm2 = vmmov (!%p1933_p2), 0   ;;  %s3640_s29 = sld [smem:[#allocation26_spill]] (!%p1933_p2) }
  0xcd   : > { %2077 = vmatprep.subr.bf16.mxu0 %v2076_v4  ;;  %v493_v14 = vld [vmem:[#allocation10 + $0x58] sm:$0xff]  ;;  %v2082_v15 = vpack.c.bf16 %v488_v12, %v486_v11  ;;  %v490_v17 = vld [vmem:[#allocation10 + $0x40] sm:$0xff]  ;;  %v492_v18 = vld [vmem:[#allocation10 + $0x50] sm:$0xff]  ;;  %s3641_s11 = sld [smem:[#allocation27_spill]] (!%p1933_p2) }
  0xce   : > { %2079 = vmatpush1.bf16.msra.mxu0 %v2078_v9  ;;  %v2084_v16 = vpack.c.bf16 %v493_v14, %v491_v13  ;;  %v495_v19 = vld [vmem:[#allocation10 + $0x68] sm:$0xff]  ;;  %v497_v20 = vld [vmem:[#allocation10 + $0x78] sm:$0xff]  ;;  %v2086_v21 = vpack.c.bf16 %v492_v18, %v490_v17  ;;  %v494_v23 = vld [vmem:[#allocation10 + $0x60] sm:$0xff]  ;;  %v518_v54 = vsub.s32 0, %v3231_v53  ;;  %v522_v62 = vsub.s32 1, %v3231_v53 }
  0xcf   : > { %2081 = vmatprep.subr.bf16.mxu0 %v2080_v10  ;;  %v2088_v22 = vpack.c.bf16 %v497_v20, %v495_v19  ;;  %v496_v24 = vld [vmem:[#allocation10 + $0x70] sm:$0xff]  ;;  %v499_v25 = vld [vmem:[#allocation10 + $0x88] sm:$0xff]  ;;  %v501_v26 = vld [vmem:[#allocation10 + $0x98] sm:$0xff] }
  0xd0   : > { %v691_v27 = vld [vmem:[#allocation3] sm:$0xff]  ;;  %v2090_v28 = vpack.c.bf16 %v496_v24, %v494_v23  ;;  %v2092_v29 = vpack.c.bf16 %v501_v26, %v499_v25  ;;  %v498_v30 = vld [vmem:[#allocation10 + $0x80] sm:$0xff]  ;;  %v500_v31 = vld [vmem:[#allocation10 + $0x90] sm:$0xff] }
  0xd1   : > { %712 = vrot.lane.b32.xlu0 %v691_v27, %s2912_s24  ;;  %v503_v32 = vld [vmem:[#allocation10 + $0xa8] sm:$0xff]  ;;  %v505_v33 = vld [vmem:[#allocation10 + $0xb8] sm:$0xff]  ;;  %v2094_v34 = vpack.c.bf16 %v500_v31, %v498_v30  ;;  %v502_v36 = vld [vmem:[#allocation10 + $0xa0] sm:$0xff] }
  0xd2   : > { %2083 = vmatpush1.bf16.msra.mxu0 %v2082_v15  ;;  %v2096_v35 = vpack.c.bf16 %v505_v33, %v503_v32  ;;  %v504_v37 = vld [vmem:[#allocation10 + $0xb0] sm:$0xff]  ;;  %v507_v38 = vld [vmem:[#allocation10 + $0xc8] sm:$0xff]  ;;  %v509_v39 = vld [vmem:[#allocation10 + $0xd8] sm:$0xff] }
  0xd3   : > { %2085 = vmatprep.subr.bf16.mxu0 %v2084_v16  ;;  %v2098_v40 = vpack.c.bf16 %v504_v37, %v502_v36  ;;  %v2100_v41 = vpack.c.bf16 %v509_v39, %v507_v38  ;;  %v506_v42 = vld [vmem:[#allocation10 + $0xc0] sm:$0xff]  ;;  %v508_v43 = vld [vmem:[#allocation10 + $0xd0] sm:$0xff]  ;;  %v511_v44 = vld [vmem:[#allocation10 + $0xe8] sm:$0xff] }
  0xd4   : > { %v513_v45 = vld [vmem:[#allocation10 + $0xf8] sm:$0xff]  ;;  %v2102_v46 = vpack.c.bf16 %v508_v43, %v506_v42  ;;  %v510_v48 = vld [vmem:[#allocation10 + $0xe0] sm:$0xff]  ;;  %v512_v49 = vld [vmem:[#allocation10 + $0xf0] sm:$0xff] }
  0xd5   : > { %v2104_v47 = vpack.c.bf16 %v513_v45, %v511_v44  ;;  %v2106_v50 = vpack.c.bf16 %v512_v49, %v510_v48  ;;  %v478_v51 = vld [vmem:[%s3206_s22] sm:$0xff]  ;;  %v514_v55 = vld [vmem:[%s3600_s2] sm:$0x3]  ;;  %v694_v58 = vld [vmem:[#allocation6] sm:$0xff] }
  0xd6   : > { %2087 = vmatpush1.bf16.msra.mxu0 %v2086_v21  ;;  %v3239_v56 = vrot.slane %v514_v55, %v518_v54  ;;  %v3245_v0 = vrot.slane %v514_v55, %v522_v62  ;;  %v695_v2 = vld [vmem:[#allocation6 + $0x8] sm:$0xff]  ;;  %v616_v10 = vld [vmem:[#allocation12 + $0x8] sm:$0xff]  ;;  %v615_v15 = vld [vmem:[#allocation12] sm:$0xff] }
  0xd7   : > { %2089 = vmatprep.subr.bf16.mxu0 %v2088_v22  ;;  %v620_v11 = vld [vmem:[#allocation12 + $0x28] sm:$0xff]  ;;  %v618_v12 = vld [vmem:[#allocation12 + $0x18] sm:$0xff]  ;;  %v619_v16 = vld [vmem:[#allocation12 + $0x20] sm:$0xff] }
  0xd8   : > { %v3255_v13 = vpack.c.bf16 %v620_v11, %v616_v10  ;;  %v622_v14 = vld [vmem:[#allocation12 + $0x38] sm:$0xff]  ;;  %v3259_v18 = vpack.c.bf16 %v619_v16, %v615_v15  ;;  %v617_v19 = vld [vmem:[#allocation12 + $0x10] sm:$0xff]  ;;  %v624_v21 = vld [vmem:[#allocation12 + $0x48] sm:$0xff] }
  0xd9   : > { %v3257_v17 = vpack.c.bf16 %v622_v14, %v618_v12  ;;  %v621_v20 = vld [vmem:[#allocation12 + $0x30] sm:$0xff]  ;;  %v628_v23 = vld [vmem:[#allocation12 + $0x68] sm:$0xff]  ;;  %v626_v24 = vld [vmem:[#allocation12 + $0x58] sm:$0xff] }
  0xda   : > { %2091 = vmatpush1.bf16.msra.mxu0 %v2090_v28  ;;  %v3262_v22 = vpack.c.bf16 %v621_v20, %v617_v19  ;;  %v630_v25 = vld [vmem:[#allocation12 + $0x78] sm:$0xff]  ;;  %v3266_v26 = vpack.c.bf16 %v628_v23, %v624_v21  ;;  %v623_v28 = vld [vmem:[#allocation12 + $0x40] sm:$0xff]  ;;  %v625_v30 = vld [vmem:[#allocation12 + $0x50] sm:$0xff] }
  0xdb   : > { %2093 = vmatprep.subr.bf16.mxu0 %v2092_v29  ;;  %2141 = vmatprep.subr.bf16.mxu1 %v3257_v17  ;;  %v3268_v27 = vpack.c.bf16 %v630_v25, %v626_v24  ;;  %v627_v29 = vld [vmem:[#allocation12 + $0x60] sm:$0xff]  ;;  %v629_v32 = vld [vmem:[#allocation12 + $0x70] sm:$0xff]  ;;  %v632_v33 = vld [vmem:[#allocation12 + $0x88] sm:$0xff] }
  0xdc   : > { %2143 = vmatpush1.bf16.msra.mxu1 %v3262_v22  ;;  %v3271_v31 = vpack.c.bf16 %v627_v29, %v623_v28  ;;  %v634_v37 = vld [vmem:[#allocation12 + $0x98] sm:$0xff]  ;;  %v631_v39 = vld [vmem:[#allocation12 + $0x80] sm:$0xff]  ;;  %v633_v42 = vld [vmem:[#allocation12 + $0x90] sm:$0xff] }
  0xdd   : > { %2145 = vmatprep.subr.bf16.mxu1 %v3268_v27  ;;  %v638_v38 = vld [vmem:[#allocation12 + $0xb8] sm:$0xff]  ;;  %v637_v43 = vld [vmem:[#allocation12 + $0xb0] sm:$0xff]  ;;  %v640_v45 = vld [vmem:[#allocation12 + $0xc8] sm:$0xff] }
  0xde   : > { %2095 = vmatpush1.bf16.msra.mxu0 %v2094_v34  ;;  %v636_v34 = vld [vmem:[#allocation12 + $0xa8] sm:$0xff]  ;;  %v3286_v48 = vpack.c.bf16 %v637_v43, %v633_v42  ;;  %v643_v52 = vld [vmem:[#allocation12 + $0xe0] sm:$0xff]  ;;  %v653_v12 = vld [vmem:[#allocation12 + $0x130] sm:$0xff] }
  0xdf   : > { %2097 = vmatprep.subr.bf16.mxu0 %v2096_v35  ;;  %v3275_v35 = vpack.c.bf16 %v629_v32, %v625_v30  ;;  %v3277_v36 = vpack.c.bf16 %v636_v34, %v632_v33  ;;  %v479_v10 = vld [vmem:[%s3206_s22 + $0x8] sm:$0xff]  ;;  %v658_v16 = vld [vmem:[#allocation12 + $0x158] sm:$0xff]  ;;  %v480_v21 = vld [vmem:[%s3206_s22 + $0x10] sm:$0xff] }
  0xe0   : > { %v656_v14 = vld [vmem:[#allocation12 + $0x148] sm:$0xff]  ;;  %v662_v19 = vld [vmem:[#allocation12 + $0x178] sm:$0xff]  ;;  %v655_v25 = vld [vmem:[#allocation12 + $0x140] sm:$0xff] }
  0xe1   : > { %2147 = vmatpush1.bf16.msra.mxu1 %v3275_v35  ;;  %v660_v15 = vld [vmem:[#allocation12 + $0x168] sm:$0xff]  ;;  %v659_v28 = vld [vmem:[#allocation12 + $0x160] sm:$0xff]  ;;  %v657_v29 = vld [vmem:[#allocation12 + $0x150] sm:$0xff]  ;;  %v3318_v30 = vpack.c.bf16 %v662_v19, %v658_v16 }
  0xe2   : > { %2099 = vmatpush1.bf16.msra.mxu0 %v2098_v40  ;;  %v3279_v40 = vpack.c.bf16 %v638_v38, %v634_v37  ;;  %v3315_v24 = vpack.c.bf16 %v660_v15, %v656_v14  ;;  %v661_v32 = vld [vmem:[#allocation12 + $0x170] sm:$0xff]  ;;  %v664_v33 = vld [vmem:[#allocation12 + $0x188] sm:$0xff]  ;;  %v666_v37 = vld [vmem:[#allocation12 + $0x198] sm:$0xff] }
  0xe3   : > { %2101 = vmatprep.subr.bf16.mxu0 %v2100_v41  ;;  %v635_v41 = vld [vmem:[#allocation12 + $0xa0] sm:$0xff]  ;;  %v668_v34 = vld [vmem:[#allocation12 + $0x1a8] sm:$0xff]  ;;  %v670_v38 = vld [vmem:[#allocation12 + $0x1b8] sm:$0xff]  ;;  %v3327_v42 = vpack.c.bf16 %v661_v32, %v657_v29 }
  0xe4   : > { %v3282_v44 = vpack.c.bf16 %v635_v41, %v631_v39  ;;  %2149 = vmatprep.subr.bf16.mxu1 %v3279_v40  ;;  %v481_v39 = vld [vmem:[%s3206_s22 + $0x18] sm:$0xff]  ;;  %v3323_v41 = vpack.c.bf16 %v659_v28, %v655_v25  ;;  %v3329_v43 = vpack.c.bf16 %v668_v34, %v664_v33  ;;  %v671_v19 = vld [vmem:[#allocation12 + $0x1c0] sm:$0xff]  ;;  %v673_v25 = vld [vmem:[#allocation12 + $0x1d0] sm:$0xff] }
  0xe5   : > { %2151 = vmatpush1.bf16.msra.mxu1 %v3286_v48  ;;  %v677_v29 = vld [vmem:[#allocation12 + $0x1f0] sm:$0xff]  ;;  %v692_v34 = vld [vmem:[#allocation4] sm:$0xff] }
  0xe6   : > { %2103 = vmatpush1.bf16.msra.mxu0 %v2102_v46  ;;  %v644_v46 = vld [vmem:[#allocation12 + $0xe8] sm:$0xff]  ;;  %v3358_v32 = vpack.c.bf16 %v677_v29, %v673_v25 }
  0xe7   : > { %2105 = vmatprep.subr.bf16.mxu0 %v2104_v47  ;;  %v642_v47 = vld [vmem:[#allocation12 + $0xd8] sm:$0xff]  ;;  %v3288_v49 = vpack.c.bf16 %v644_v46, %v640_v45  ;;  %v663_v45 = vld [vmem:[#allocation12 + $0x180] sm:$0xff] }
  0xe8   : > { %v667_v46 = vld [vmem:[#allocation12 + $0x1a0] sm:$0xff] }
  0xea   : > { %2107 = vmatpush1.bf16.msra.mxu0 %v2106_v50  ;;  %v646_v50 = vld [vmem:[#allocation12 + $0xf8] sm:$0xff] }
  0xeb   : > { %2109 = vmatprep.subr.bf16.mxu0 %v3255_v13  ;;  %v3291_v55 = vpack.c.bf16 %v646_v50, %v642_v47  ;;  %v665_v47 = vld [vmem:[#allocation12 + $0x190] sm:$0xff]  ;;  %v3332_v50 = vpack.c.bf16 %v670_v38, %v666_v37 }
  0xed   : > { %591 = vmatmul.mubr.f32.vlgmr.msra.gmra.mrb[0].mxu0 %v478_v51  ;;  %v639_v51 = vld [vmem:[#allocation12 + $0xc0] sm:$0xff]  ;;  %2153 = vmatprep.subr.bf16.mxu1 %v3291_v55 }
  0xee   : > { %596 = vmatprep.mubr.f32.mxu0 %v2911_v8  ;;  %2111 = vmatpush1.bf16.msra.mxu0 %v3259_v18 }
  0xef   : > { %2113 = vmatprep.subr.bf16.mxu0 %v3266_v26 }
  0xf1   : > { %597 = vmatmul.mubr.f32.gmra.mrb[2].mxu0 %v479_v10 }
  0xf2   : > { %2115 = vmatpush1.bf16.msra.mxu0 %v3271_v31  ;;  %602 = vmatprep.mubr.f32.mxu0 %v2911_v8 }
  0xf3   : > { %2117 = vmatprep.subr.bf16.mxu0 %v3277_v36 }
  0xf5   : > { %603 = vmatmul.mubr.f32.gmra.mrb[4].mxu0 %v480_v21  ;;  %v675_v21 = vld [vmem:[#allocation12 + $0x1e0] sm:$0xff] }
  0xf6   : > { %2119 = vmatpush1.bf16.msra.mxu0 %v3282_v44  ;;  %608 = vmatprep.mubr.f32.mxu0 %v2911_v8  ;;  %v3356_v28 = vpack.c.bf16 %v675_v21, %v671_v19 }
  0xf7   : > { %2121 = vmatprep.subr.bf16.mxu0 %v3288_v49 }
  0xf9   : > { %609 = vmatmul.mubr.f32.gmra.mrb[6].mxu0 %v481_v39 }
  0xfa   : > { %798 = vmatprep.mubr.f32.mxu0 %v2911_v8 }
 0x143   : > { %v713_v10 = vpop.permute.xlu0 %712 }
 0x1c0   : > { %v592_v57 = vpop.f32.mrb[0].mxu0 }
 0x1c1   : > { %v593_v59 = vadd.f32 %v592_v57, %v3239_v56  ;;  %v594_v60 = vpop.f32.mrb[1].mxu0  ;;  %v641_v57 = vld [vmem:[#allocation12 + $0xd0] sm:$0xff] }
 0x1c2   : > { %v595_v1 = vadd.f32 %v594_v60, %v3245_v0  ;;  %v652_v60 = vld [vmem:[#allocation12 + $0x128] sm:$0xff] }
 0x1c3   : > { %v696_v61 = vadd.f32 %v694_v58, %v593_v59  ;;  %v645_v58 = vld [vmem:[#allocation12 + $0xf0] sm:$0xff]  ;;  %v648_v59 = vld [vmem:[#allocation12 + $0x108] sm:$0xff] }
 0x1c4   : > { %v3248_v3 = vadd.f32 %v695_v2, %v595_v1  ;;  %v3294_v1 = vpack.c.bf16 %v643_v52, %v639_v51  ;;  %v647_v2 = vld [vmem:[#allocation12 + $0x100] sm:$0xff]  ;;  %v669_v51 = vld [vmem:[#allocation12 + $0x1b0] sm:$0xff]  ;;  %v672_v52 = vld [vmem:[#allocation12 + $0x1c8] sm:$0xff] }
 0x1c5   : > { %v1917_v63 = vmul.f32 -1.442695, %v696_v61  ;;  %v650_v61 = vld [vmem:[#allocation12 + $0x118] sm:$0xff] }
 0x1c6   : > { %2123 = vmatpush1.bf16.msra.mxu0 %v3294_v1 }
 0x1c7   : > { %2550 = vpow2.f32 %v1917_v63  ;;  %v654_v63 = vld [vmem:[#allocation12 + $0x138] sm:$0xff] }
 0x1c8   : > { %2552 = vtanh.f32 %v3248_v3  ;;  %v3304_v11 = vpack.c.bf16 %v654_v63, %v650_v61  ;;  %v3340_v61 = vpack.c.bf16 %v669_v51, %v665_v47  ;;  %v679_v51 = vld [vmem:[%s3602_s4] sm:$0x3] }
 0x1d1   : > { %v2551_v4 = vpop.eup %2550 }
 0x1d2   : > { %v701_v5 = vadd.f32 1.0, %v2551_v4  ;;  %v2553_v6 = vpop.eup %2552  ;;  %v3298_v4 = vpack.c.bf16 %v645_v58, %v641_v57  ;;  %v676_v57 = vld [vmem:[#allocation12 + $0x1e8] sm:$0xff]  ;;  %v674_v58 = vld [vmem:[#allocation12 + $0x1d8] sm:$0xff] }
 0x1d3   : > { %v3342_v63 = vpack.c.bf16 %v676_v57, %v672_v52  ;;  %v3406_v52 = vrot.slane %v679_v51, %v518_v54 }
 0x1d4   : > { %2554 = vrcp.f32 %v701_v5  ;;  %v3300_v5 = vpack.c.bf16 %v652_v60, %v648_v59  ;;  %2155 = vmatpush1.bf16.msra.mxu1 %v3298_v4  ;;  %v678_v59 = vld [vmem:[#allocation12 + $0x1f8] sm:$0xff]  ;;  %v3336_v60 = vpack.c.bf16 %v667_v46, %v663_v45 }
 0x1d5   : > { %2157 = vmatprep.subr.bf16.mxu1 %v3304_v11 }
 0x1d6   : > { %2125 = vmatprep.subr.bf16.mxu0 %v3300_v5 }
 0x1de   : > { %v3251_v7 = vpop.eup %2554 }
 0x1df   : > { %v716_v9 = vmul.f32 %v3251_v7, %v2553_v6  ;;  %v651_v6 = vld [vmem:[#allocation12 + $0x120] sm:$0xff]  ;;  %v715_v14 = vmul.f32 %v3251_v7, %v713_v10 }
 0x1e0   : > { %v3308_v20 = vpack.c.bf16 %v651_v6, %v647_v2  ;;  %v3345_v2 = vpack.c.bf16 %v678_v59, %v674_v58  ;;  %v1918_v6 = vmul.f32 -1.442695, %v3248_v3  ;;  %v693_v3 = vld [vmem:[#allocation5] sm:$0xff] }
 0x1e1   : > { %718 = vrot.lane.b32.xlu0 %v716_v9, %s2912_s24  ;;  %v649_v9 = vld [vmem:[#allocation12 + $0x110] sm:$0xff] }
 0x1e2   : > { %v3313_v23 = vpack.c.bf16 %v653_v12, %v649_v9  ;;  %2127 = vmatpush1.bf16.msra.mxu0 %v3308_v20  ;;  %2556 = vpow2.f32 %v1918_v6 }
 0x1e3   : > { %2129 = vmatprep.subr.bf16.mxu0 %v3315_v24 }
 0x1e4   : > { %2159 = vmatpush1.bf16.msra.mxu1 %v3313_v23 }
 0x1e5   : > { %2161 = vmatprep.subr.bf16.mxu1 %v3318_v30  ;;  %892 = vrot.lane.b32.xlu0 %v693_v3, %s2912_s24 }
 0x1e6   : > { %2131 = vmatpush1.bf16.msra.mxu0 %v3323_v41 }
 0x1e7   : > { %2133 = vmatprep.subr.bf16.mxu0 %v3329_v43 }
 0x1e8   : > { %2163 = vmatpush1.bf16.msra.mxu1 %v3327_v42 }
 0x1e9   : > { %2165 = vmatprep.subr.bf16.mxu1 %v3332_v50 }
 0x1ea   : > { %2135 = vmatpush1.bf16.msra.mxu0 %v3336_v60 }
 0x1eb   : > { %2137 = vmatprep.subr.bf16.mxu0 %v3342_v63 }
 0x1ec   : > { %2167 = vmatpush1.bf16.msra.mxu1 %v3340_v61  ;;  %v2557_v9 = vpop.eup %2556 }
 0x1ed   : > { %2169 = vmatprep.subr.bf16.mxu1 %v3345_v2  ;;  %v708_v12 = vadd.f32 1.0, %v2557_v9 }
 0x1ee   : > { %2139 = vmatpush1.bf16.msra.mxu0 %v3356_v28 }
 0x1ef   : > { %2558 = vrcp.f32 %v708_v12  ;;  %2173 = vmatprep.subr.bf16.mxu0 %v3255_v13 }
 0x1f0   : > { %2171 = vmatpush1.bf16.msra.mxu1 %v3358_v32 }
 0x1f1   : > { %2205 = vmatprep.subr.bf16.mxu1 %v3257_v17 }
 0x1f9   : > { %v2559_v7 = vpop.eup %2558 }
 0x253   : > { %v719_v15 = vpop.permute.xlu0 %718 }
 0x254   : > { %v3353_v16 = vadd.f32 %v719_v15, %v715_v14  ;;  %v3412_v15 = vrot.slane %v679_v51, %v522_v62 }
 0x256   : > { %2560 = vtanh.f32 %v3353_v16 }
 0x260   : > { %v2561_v33 = vpop.eup %2560 }
 0x261   : > { %v723_v37 = vmul.f32 %v2561_v33, %v2559_v7 }
 0x263   : > { %v2545_v38 = vpack.i.bf16 %v692_v34, %v723_v37 }
 0x265   : > { %2546 = vrot.lane.b32.xlu1 %v2545_v38, %s2912_s24 }
 0x2d7   : > { %v2547_v39 = vpop.permute.xlu1 %2546 }
 0x2d8   : > { %v2549_v45 = vunpack.i.h.bf16 %v2547_v39  ;;  %v2548_v46 = vunpack.i.l.bf16 %v2547_v39 }
 0x2da   : > { %v733_v47 = vsel %vm732_vm1, %v2548_v46, %v2549_v45 }
 0x2db   : > { %799 = vmatmul.mubr.f32.vlgmr.msra.gmra.mrb[2].mxu0 %v733_v47  ;;  %870 = vmatmul.mubr.f32.vlgmr.msra.gmra.mrb[0].mxu1 %v733_v47 }
 0x2dc   : > { %2175 = vmatpush1.bf16.msra.mxu0 %v3259_v18  ;;  %2207 = vmatpush1.bf16.msra.mxu1 %v3262_v22 }
 0x2dd   : > { %2177 = vmatprep.subr.bf16.mxu0 %v3266_v26  ;;  %2209 = vmatprep.subr.bf16.mxu1 %v3268_v27 }
 0x2de   : > { %997 = vmatprep.mubr.f32.mxu0 %v2911_v8  ;;  %1068 = vmatprep.mubr.f32.mxu1 %v2911_v8 }
 0x2e0   : > { %2179 = vmatpush1.bf16.msra.mxu0 %v3271_v31  ;;  %2211 = vmatpush1.bf16.msra.mxu1 %v3275_v35 }
 0x2e1   : > { %2181 = vmatprep.subr.bf16.mxu0 %v3277_v36  ;;  %2213 = vmatprep.subr.bf16.mxu1 %v3279_v40 }
 0x2e4   : > { %2183 = vmatpush1.bf16.msra.mxu0 %v3282_v44  ;;  %2215 = vmatpush1.bf16.msra.mxu1 %v3286_v48 }
 0x2e5   : > { %2185 = vmatprep.subr.bf16.mxu0 %v3288_v49  ;;  %2217 = vmatprep.subr.bf16.mxu1 %v3291_v55 }
 0x2e8   : > { %2187 = vmatpush1.bf16.msra.mxu0 %v3294_v1  ;;  %2219 = vmatpush1.bf16.msra.mxu1 %v3298_v4 }
 0x2e9   : > { %2189 = vmatprep.subr.bf16.mxu0 %v3300_v5  ;;  %2221 = vmatprep.subr.bf16.mxu1 %v3304_v11 }
 0x2ec   : > { %2191 = vmatpush1.bf16.msra.mxu0 %v3308_v20  ;;  %2223 = vmatpush1.bf16.msra.mxu1 %v3313_v23 }
 0x2ed   : > { %2193 = vmatprep.subr.bf16.mxu0 %v3315_v24  ;;  %2225 = vmatprep.subr.bf16.mxu1 %v3318_v30 }
 0x2f0   : > { %2195 = vmatpush1.bf16.msra.mxu0 %v3323_v41  ;;  %2227 = vmatpush1.bf16.msra.mxu1 %v3327_v42 }
 0x2f1   : > { %2197 = vmatprep.subr.bf16.mxu0 %v3329_v43  ;;  %2229 = vmatprep.subr.bf16.mxu1 %v3332_v50 }
 0x2f4   : > { %2199 = vmatpush1.bf16.msra.mxu0 %v3336_v60  ;;  %2231 = vmatpush1.bf16.msra.mxu1 %v3340_v61 }
 0x2f5   : > { %2201 = vmatprep.subr.bf16.mxu0 %v3342_v63  ;;  %2233 = vmatprep.subr.bf16.mxu1 %v3345_v2 }
 0x2f8   : > { %2203 = vmatpush1.bf16.msra.mxu0 %v3356_v28  ;;  %2235 = vmatpush1.bf16.msra.mxu1 %v3358_v32 }
 0x2f9   : > { %2237 = vmatprep.subr.bf16.mxu0 %v3255_v13  ;;  %2269 = vmatprep.subr.bf16.mxu1 %v3257_v17 }
 0x3ae   : > { %v800_v57 = vpop.f32.mrb[2].mxu0  ;;  %v871_v58 = vpop.f32.mrb[0].mxu1 }
 0x3af   : > { %v2424_v59 = vadd.f32 %v800_v57, %v3239_v56  ;;  %v876_v6 = vadd.f32 %v871_v58, %v3406_v52  ;;  %v802_v9 = vpop.f32.mrb[3].mxu0  ;;  %v873_v10 = vpop.f32.mrb[1].mxu1 }
 0x3b0   : > { %v2425_v19 = vadd.f32 %v802_v9, %v3245_v0  ;;  %v877_v54 = vadd.f32 %v873_v10, %v3412_v15  ;;  %v893_v9 = vpop.permute.xlu0 %892 }
 0x3b1   : > { %v1921_v12 = vmul.f32 -1.442695, %v2424_v59  ;;  %v1919_v14 = vmul.f32 -1.442695, %v876_v6 }
 0x3b2   : > { %v1922_v62 = vmul.f32 -1.442695, %v2425_v19  ;;  %v1920_v6 = vmul.f32 -1.442695, %v877_v54 }
 0x3b3   : > { %2562 = vpow2.f32 %v1921_v12 }
 0x3b4   : > { %2564 = vpow2.f32 %v1919_v14 }
 0x3b5   : > { %2566 = vtanh.f32 %v2425_v19 }
 0x3b6   : > { %2568 = vtanh.f32 %v877_v54 }
 0x3bd   : > { %v2563_v21 = vpop.eup %2562 }
 0x3be   : > { %v2565_v25 = vpop.eup %2564  ;;  %v909_v29 = vadd.f32 1.0, %v2563_v21 }
 0x3bf   : > { %v881_v3 = vadd.f32 1.0, %v2565_v25  ;;  %v2567_v7 = vpop.eup %2566 }
 0x3c0   : > { %2570 = vrcp.f32 %v909_v29  ;;  %v2569_v33 = vpop.eup %2568 }
 0x3c1   : > { %2572 = vrcp.f32 %v881_v3 }
 0x3c2   : > { %2574 = vpow2.f32 %v1922_v62 }
 0x3ca   : > { %v2571_v34 = vpop.eup %2570 }
 0x3cb   : > { %v2573_v37 = vpop.eup %2572  ;;  %v920_v38 = vmul.f32 %v2571_v34, %v2567_v7  ;;  %v919_v46 = vmul.f32 %v2571_v34, %v3353_v16 }
 0x3cc   : > { %v896_v53 = vmul.f32 %v2573_v37, %v2569_v33  ;;  %v2575_v39 = vpop.eup %2574  ;;  %v895_v12 = vmul.f32 %v2573_v37, %v893_v9 }
 0x3cd   : > { %922 = vrot.lane.b32.xlu1 %v920_v38, %s2912_s24  ;;  %v916_v45 = vadd.f32 1.0, %v2575_v39 }
 0x3cf   : > { %2576 = vrcp.f32 %v916_v45 }
 0x3d1   : > { %898 = vrot.lane.b32.xlu1 %v896_v53, %s2912_s24 }
 0x3d9   : > { %v2577_v57 = vpop.eup %2576 }
 0x43f   : > { %v923_v47 = vpop.permute.xlu1 %922 }
 0x440   : > { %v3419_v51 = vadd.f32 %v923_v47, %v919_v46 }
 0x442   : > { %2578 = vtanh.f32 %v3419_v51 }
 0x443   : > { %2580 = vpow2.f32 %v1920_v6  ;;  %v899_v10 = vpop.permute.xlu1 %898 }
 0x444   : > { %v3423_v19 = vadd.f32 %v899_v10, %v895_v12 }
 0x446   : > { %2582 = vtanh.f32 %v3423_v19 }
 0x44c   : > { %v2579_v58 = vpop.eup %2578 }
 0x44d   : > { %v927_v59 = vmul.f32 %v2579_v58, %v2577_v57  ;;  %v2581_v14 = vpop.eup %2580 }
 0x44e   : > { %v888_v16 = vadd.f32 1.0, %v2581_v14 }
 0x44f   : > { %929 = vrot.lane.b32.xlu0 %v927_v59, %s2912_s24 }
 0x450   : > { %2584 = vrcp.f32 %v888_v16  ;;  %v2583_v21 = vpop.eup %2582 }
 0x45a   : > { %v2585_v25 = vpop.eup %2584 }
 0x45b   : > { %v903_v29 = vmul.f32 %v2585_v25, %v2583_v21 }
 0x4c1   : > { %v930_v3 = vpop.permute.xlu0 %929 }
 0x4c2   : > { %v932_v7 = vsel %vm732_vm1, %v930_v3, %v903_v29 }
 0x4c3   : > { %998 = vmatmul.mubr.f32.vlgmr.msra.gmra.mrb[4].mxu0 %v932_v7  ;;  %1069 = vmatmul.mubr.f32.vlgmr.msra.gmra.mrb[2].mxu1 %v932_v7 }
 0x4c4   : > { %2239 = vmatpush1.bf16.msra.mxu0 %v3259_v18  ;;  %2271 = vmatpush1.bf16.msra.mxu1 %v3262_v22 }
 0x4c5   : > { %2241 = vmatprep.subr.bf16.mxu0 %v3266_v26  ;;  %2273 = vmatprep.subr.bf16.mxu1 %v3268_v27 }
 0x4c6   : > { %1192 = vmatprep.mubr.f32.mxu0 %v2911_v8  ;;  %1263 = vmatprep.mubr.f32.mxu1 %v2911_v8 }
 0x4c8   : > { %2243 = vmatpush1.bf16.msra.mxu0 %v3271_v31  ;;  %2275 = vmatpush1.bf16.msra.mxu1 %v3275_v35 }
 0x4c9   : > { %2245 = vmatprep.subr.bf16.mxu0 %v3277_v36  ;;  %2277 = vmatprep.subr.bf16.mxu1 %v3279_v40 }
 0x4cc   : > { %2247 = vmatpush1.bf16.msra.mxu0 %v3282_v44  ;;  %2279 = vmatpush1.bf16.msra.mxu1 %v3286_v48 }
 0x4cd   : > { %2249 = vmatprep.subr.bf16.mxu0 %v3288_v49  ;;  %2281 = vmatprep.subr.bf16.mxu1 %v3291_v55 }
 0x4d0   : > { %2251 = vmatpush1.bf16.msra.mxu0 %v3294_v1  ;;  %2283 = vmatpush1.bf16.msra.mxu1 %v3298_v4 }
 0x4d1   : > { %2253 = vmatprep.subr.bf16.mxu0 %v3300_v5  ;;  %2285 = vmatprep.subr.bf16.mxu1 %v3304_v11 }
 0x4d4   : > { %2255 = vmatpush1.bf16.msra.mxu0 %v3308_v20  ;;  %2287 = vmatpush1.bf16.msra.mxu1 %v3313_v23 }
 0x4d5   : > { %2257 = vmatprep.subr.bf16.mxu0 %v3315_v24  ;;  %2289 = vmatprep.subr.bf16.mxu1 %v3318_v30 }
 0x4d8   : > { %2259 = vmatpush1.bf16.msra.mxu0 %v3323_v41  ;;  %2291 = vmatpush1.bf16.msra.mxu1 %v3327_v42 }
 0x4d9   : > { %2261 = vmatprep.subr.bf16.mxu0 %v3329_v43  ;;  %2293 = vmatprep.subr.bf16.mxu1 %v3332_v50 }
 0x4dc   : > { %2263 = vmatpush1.bf16.msra.mxu0 %v3336_v60  ;;  %2295 = vmatpush1.bf16.msra.mxu1 %v3340_v61 }
 0x4dd   : > { %2265 = vmatprep.subr.bf16.mxu0 %v3342_v63  ;;  %2297 = vmatprep.subr.bf16.mxu1 %v3345_v2 }
 0x4e0   : > { %2267 = vmatpush1.bf16.msra.mxu0 %v3356_v28  ;;  %2299 = vmatpush1.bf16.msra.mxu1 %v3358_v32 }
 0x4e1   : > { %2301 = vmatprep.subr.bf16.mxu1 %v3255_v13  ;;  %2333 = vmatprep.subr.bf16.mxu0 %v3257_v17 }
 0x596   : > { %v999_v54 = vpop.f32.mrb[4].mxu0  ;;  %v1070_v33 = vpop.f32.mrb[2].mxu1 }
 0x597   : > { %v2426_v34 = vadd.f32 %v999_v54, %v3239_v56  ;;  %v1075_v37 = vadd.f32 %v1070_v33, %v3406_v52  ;;  %v1001_v38 = vpop.f32.mrb[5].mxu0  ;;  %v1072_v53 = vpop.f32.mrb[3].mxu1 }
 0x598   : > { %v2427_v45 = vadd.f32 %v1001_v38, %v3245_v0  ;;  %v1076_v46 = vadd.f32 %v1072_v53, %v3412_v15 }
 0x599   : > { %v1925_v62 = vmul.f32 -1.442695, %v2426_v34  ;;  %v1923_v39 = vmul.f32 -1.442695, %v1075_v37 }
 0x59a   : > { %v1926_v14 = vmul.f32 -1.442695, %v2427_v45  ;;  %v1924_v34 = vmul.f32 -1.442695, %v1076_v46 }
 0x59b   : > { %2586 = vpow2.f32 %v1925_v62 }
 0x59c   : > { %2588 = vpow2.f32 %v1923_v39 }
 0x59d   : > { %2590 = vtanh.f32 %v2427_v45 }
 0x59e   : > { %2592 = vtanh.f32 %v1076_v46 }
 0x5a5   : > { %v2587_v47 = vpop.eup %2586 }
 0x5a6   : > { %v2589_v13 = vpop.eup %2588  ;;  %v1104_v57 = vadd.f32 1.0, %v2587_v47 }
 0x5a7   : > { %v1080_v17 = vadd.f32 1.0, %v2589_v13  ;;  %v2591_v58 = vpop.eup %2590 }
 0x5a8   : > { %2594 = vrcp.f32 %v1104_v57  ;;  %v2593_v59 = vpop.eup %2592 }
 0x5a9   : > { %2596 = vrcp.f32 %v1080_v17 }
 0x5aa   : > { %2598 = vpow2.f32 %v1926_v14 }
 0x5b2   : > { %v2595_v6 = vpop.eup %2594 }
 0x5b3   : > { %v2597_v9 = vpop.eup %2596  ;;  %v1115_v10 = vmul.f32 %v2595_v6, %v2591_v58  ;;  %v1114_v25 = vmul.f32 %v2595_v6, %v3419_v51 }
 0x5b4   : > { %v1091_v12 = vmul.f32 %v2597_v9, %v2593_v59  ;;  %v2599_v16 = vpop.eup %2598  ;;  %v1090_v38 = vmul.f32 %v2597_v9, %v3423_v19 }
 0x5b5   : > { %1117 = vrot.lane.b32.xlu1 %v1115_v10, %s2912_s24  ;;  %v1111_v21 = vadd.f32 1.0, %v2599_v16 }
 0x5b6   : > { %1093 = vrot.lane.b32.xlu0 %v1091_v12, %s2912_s24 }
 0x5b7   : > { %2600 = vrcp.f32 %v1111_v21 }
 0x5c1   : > { %v2601_v7 = vpop.eup %2600 }
 0x627   : > { %v1118_v29 = vpop.permute.xlu1 %1117 }
 0x628   : > { %v3468_v3 = vadd.f32 %v1118_v29, %v1114_v25  ;;  %v1094_v37 = vpop.permute.xlu0 %1093 }
 0x629   : > { %v3473_v62 = vadd.f32 %v1094_v37, %v1090_v38 }
 0x62a   : > { %2602 = vtanh.f32 %v3468_v3 }
 0x62b   : > { %2604 = vpow2.f32 %v1924_v34 }
 0x62c   : > { %2606 = vtanh.f32 %v3473_v62 }
 0x634   : > { %v2603_v54 = vpop.eup %2602 }
 0x635   : > { %v1122_v33 = vmul.f32 %v2603_v54, %v2601_v7  ;;  %v2605_v53 = vpop.eup %2604 }
 0x636   : > { %v1087_v51 = vadd.f32 1.0, %v2605_v53  ;;  %v2607_v39 = vpop.eup %2606 }
 0x637   : > { %1124 = vrot.lane.b32.xlu1 %v1122_v33, %s2912_s24 }
 0x638   : > { %2608 = vrcp.f32 %v1087_v51 }
 0x642   : > { %v2609_v45 = vpop.eup %2608 }
 0x643   : > { %v1098_v47 = vmul.f32 %v2609_v45, %v2607_v39 }
 0x6a9   : > { %v1125_v13 = vpop.permute.xlu1 %1124 }
 0x6aa   : > { %v1127_v57 = vsel %vm732_vm1, %v1125_v13, %v1098_v47 }
 0x6ab   : > { %1193 = vmatmul.mubr.f32.vlgmr.msra.gmra.mrb[6].mxu0 %v1127_v57  ;;  %1264 = vmatmul.mubr.f32.vlgmr.msra.gmra.mrb[4].mxu1 %v1127_v57 }
 0x6ac   : > { %2303 = vmatpush1.bf16.msra.mxu1 %v3259_v18  ;;  %2335 = vmatpush1.bf16.msra.mxu0 %v3262_v22 }
 0x6ad   : > { %2305 = vmatprep.subr.bf16.mxu1 %v3266_v26  ;;  %2337 = vmatprep.subr.bf16.mxu0 %v3268_v27 }
 0x6ae   : > { %1387 = vmatprep.mubr.f32.mxu1 %v2911_v8  ;;  %1458 = vmatprep.mubr.f32.mxu0 %v2911_v8 }
 0x6b0   : > { %2307 = vmatpush1.bf16.msra.mxu1 %v3271_v31  ;;  %2339 = vmatpush1.bf16.msra.mxu0 %v3275_v35 }
 0x6b1   : > { %2309 = vmatprep.subr.bf16.mxu1 %v3277_v36  ;;  %2341 = vmatprep.subr.bf16.mxu0 %v3279_v40 }
 0x6b4   : > { %2311 = vmatpush1.bf16.msra.mxu1 %v3282_v44  ;;  %2343 = vmatpush1.bf16.msra.mxu0 %v3286_v48 }
 0x6b5   : > { %2313 = vmatprep.subr.bf16.mxu1 %v3288_v49  ;;  %2345 = vmatprep.subr.bf16.mxu0 %v3291_v55 }
 0x6b8   : > { %2315 = vmatpush1.bf16.msra.mxu1 %v3294_v1  ;;  %2347 = vmatpush1.bf16.msra.mxu0 %v3298_v4 }
 0x6b9   : > { %2317 = vmatprep.subr.bf16.mxu1 %v3300_v5  ;;  %2349 = vmatprep.subr.bf16.mxu0 %v3304_v11 }
 0x6bc   : > { %2319 = vmatpush1.bf16.msra.mxu1 %v3308_v20  ;;  %2351 = vmatpush1.bf16.msra.mxu0 %v3313_v23 }
 0x6bd   : > { %2321 = vmatprep.subr.bf16.mxu1 %v3315_v24  ;;  %2353 = vmatprep.subr.bf16.mxu0 %v3318_v30 }
 0x6c0   : > { %2323 = vmatpush1.bf16.msra.mxu1 %v3323_v41  ;;  %2355 = vmatpush1.bf16.msra.mxu0 %v3327_v42 }
 0x6c1   : > { %2325 = vmatprep.subr.bf16.mxu1 %v3329_v43  ;;  %2357 = vmatprep.subr.bf16.mxu0 %v3332_v50 }
 0x6c4   : > { %2327 = vmatpush1.bf16.msra.mxu1 %v3336_v60  ;;  %2359 = vmatpush1.bf16.msra.mxu0 %v3340_v61 }
 0x6c5   : > { %2329 = vmatprep.subr.bf16.mxu1 %v3342_v63  ;;  %2361 = vmatprep.subr.bf16.mxu0 %v3345_v2 }
 0x6c8   : > { %2331 = vmatpush1.bf16.msra.mxu1 %v3356_v28  ;;  %2363 = vmatpush1.bf16.msra.mxu0 %v3358_v32 }
 0x77e   : > { %v1194_v8 = vpop.f32.mrb[6].mxu0  ;;  %v1265_v18 = vpop.f32.mrb[4].mxu1 }
 0x77f   : > { %v2428_v22 = vadd.f32 %v1194_v8, %v3239_v56  ;;  %v1270_v26 = vadd.f32 %v1265_v18, %v3406_v52  ;;  %v1196_v27 = vpop.f32.mrb[7].mxu0  ;;  %v1267_v31 = vpop.f32.mrb[5].mxu1  ;;  %v1511_v8 = vld [vmem:[#allocation13] sm:$0xff] (!%p1933_p2)  ;;  %v1512_v18 = vld [vmem:[#allocation13 + $0x8] sm:$0xff] (!%p1933_p2) }
 0x780   : > { %v2429_v40 = vadd.f32 %v1196_v27, %v3245_v0  ;;  %v1271_v44 = vadd.f32 %v1267_v31, %v3412_v15  ;;  %v2365_v27 = vpack.c.bf16 (!%p1933_p2), %v1512_v18, %v1511_v8  ;;  %v1514_v31 = vld [vmem:[#allocation13 + $0x18] sm:$0xff] (!%p1933_p2)  ;;  %v1707_v8 = vld [vmem:[#allocation16 + $0x70] sm:$0xff] (!%p1933_p2) }
 0x781   : > { %v1929_v35 = vmul.f32 -1.442695, %v2428_v22  ;;  %v1927_v36 = vmul.f32 -1.442695, %v1270_v26  ;;  %v1513_v22 = vld [vmem:[#allocation13 + $0x10] sm:$0xff] (!%p1933_p2)  ;;  %v2913_v26 = vmov (!%p1933_p2), 0.0|0.0  }
 0x782   : > { %v1930_v0 = vmul.f32 -1.442695, %v2429_v40  ;;  %v1928_v63 = vmul.f32 -1.442695, %v1271_v44  ;;  %2364 = vmatprep.subr.bf16.mxu0 (!%p1933_p2), %v2913_v26  ;;  %2376 = vmatprep.subr.bf16.mxu1 (!%p1933_p2), %v2913_v26  ;;  %v1708_v18 = vld [vmem:[#allocation16 + $0x78] sm:$0xff] (!%p1933_p2) }
 0x783   : > { %2610 = vpow2.f32 %v1929_v35  ;;  %v2915_v35 = vmov (!%p1933_p2), 0.0  }
 0x784   : > { %2612 = vpow2.f32 %v1927_v36  ;;  %v1599_v36 = vld [vmem:[#allocation15] sm:$0xff] (!%p1933_p2) }
 0x785   : > { %2614 = vtanh.f32 %v2429_v40  ;;  %v2368_v40 = vpack.c.bf16 (!%p1933_p2), %v1514_v31, %v1513_v22  ;;  %v2422_v22 = vpack.c.bf16 (!%p1933_p2), %v1708_v18, %v1707_v8 }
 0x786   : > { %2616 = vtanh.f32 %v1271_v44  ;;  %v1600_v44 = vld [vmem:[#allocation15 + $0x8] sm:$0xff] (!%p1933_p2) }
 0x78d   : > { %v2611_v48 = vpop.eup %2610 }
 0x78e   : > { %v2613_v49 = vpop.eup %2612  ;;  %v1299_v55 = vadd.f32 1.0, %v2611_v48  ;;  %v1601_v48 = vld [vmem:[#allocation15 + $0x10] sm:$0xff] (!%p1933_p2) }
 0x78f   : > { %v1275_v1 = vadd.f32 1.0, %v2613_v49  ;;  %v2615_v56 = vpop.eup %2614  ;;  %v1602_v49 = vld [vmem:[#allocation15 + $0x18] sm:$0xff] (!%p1933_p2) }
 0x790   : > { %2618 = vrcp.f32 %v1299_v55  ;;  %v2617_v4 = vpop.eup %2616  ;;  %v1515_v55 = vld [vmem:[#allocation13 + $0x20] sm:$0xff] (!%p1933_p2) }
 0x791   : > { %2620 = vrcp.f32 %v1275_v1  ;;  %v1516_v1 = vld [vmem:[#allocation13 + $0x28] sm:$0xff] (!%p1933_p2) }
 0x792   : > { %2622 = vpow2.f32 %v1930_v0  ;;  %v1518_v0 = vld [vmem:[#allocation13 + $0x38] sm:$0xff] (!%p1933_p2) }
 0x79a   : > { %v2619_v5 = vpop.eup %2618 }
 0x79b   : > { %v2621_v11 = vpop.eup %2620  ;;  %v1310_v20 = vmul.f32 %v2619_v5, %v2615_v56  ;;  %v1309_v41 = vmul.f32 %v2619_v5, %v3468_v3  ;;  %v2377_v56 = vpack.c.bf16 (!%p1933_p2), %v1600_v44, %v1599_v36  ;;  %v2371_v5 = vpack.c.bf16 (!%p1933_p2), %v1516_v1, %v1515_v55 }
 0x79c   : > { %v1286_v23 = vmul.f32 %v2621_v11, %v2617_v4  ;;  %v2623_v24 = vpop.eup %2622  ;;  %v1285_v28 = vmul.f32 %v2621_v11, %v3473_v62  ;;  %v2380_v4 = vpack.c.bf16 (!%p1933_p2), %v1602_v49, %v1601_v48  ;;  %v1603_v11 = vld [vmem:[#allocation15 + $0x20] sm:$0xff] (!%p1933_p2) }
 0x79d   : > { %1312 = vrot.lane.b32.xlu0 %v1310_v20, %s2912_s24  ;;  %v1306_v30 = vadd.f32 1.0, %v2623_v24  ;;  %v1604_v20 = vld [vmem:[#allocation15 + $0x28] sm:$0xff] (!%p1933_p2) }
 0x79e   : > { %1288 = vrot.lane.b32.xlu1 %v1286_v23, %s2912_s24  ;;  %v1517_v23 = vld [vmem:[#allocation13 + $0x30] sm:$0xff] (!%p1933_p2)  ;;  %v2383_v24 = vpack.c.bf16 (!%p1933_p2), %v1604_v20, %v1603_v11 }
 0x79f   : > { %2624 = vrcp.f32 %v1306_v30  ;;  %v2374_v30 = vpack.c.bf16 (!%p1933_p2), %v1518_v0, %v1517_v23 }
 0x7a9   : > { %v2625_v50 = vpop.eup %2624 }
 0x80f   : > { %v1313_v42 = vpop.permute.xlu0 %1312 }
 0x810   : > { %v1315_v43 = vadd.f32 %v1313_v42, %v1309_v41  ;;  %v1289_v2 = vpop.permute.xlu1 %1288  ;;  %v1605_v41 = vld [vmem:[#allocation15 + $0x30] sm:$0xff] (!%p1933_p2)  ;;  %v1606_v42 = vld [vmem:[#allocation15 + $0x38] sm:$0xff] (!%p1933_p2) }
 0x811   : > { %v1291_v19 = vadd.f32 %v1289_v2, %v1285_v28  ;;  %v1610_v2 = vld [vmem:[#allocation15 + $0x58] sm:$0xff] (!%p1933_p2) }
 0x812   : > { %2626 = vtanh.f32 %v1315_v43 }
 0x813   : > { %2628 = vpow2.f32 %v1928_v63  ;;  %v1609_v63 = vld [vmem:[#allocation15 + $0x50] sm:$0xff] (!%p1933_p2) }
 0x814   : > { %2630 = vtanh.f32 %v1291_v19  ;;  %v2392_v28 = vpack.c.bf16 (!%p1933_p2), %v1610_v2, %v1609_v63 }
 0x81c   : > { %v2627_v60 = vpop.eup %2626 }
 0x81d   : > { %v1317_v61 = vmul.f32 %v2627_v60, %v2625_v50  ;;  %v2629_v32 = vpop.eup %2628  ;;  %v1607_v50 = vld [vmem:[#allocation15 + $0x40] sm:$0xff] (!%p1933_p2)  ;;  %v1608_v60 = vld [vmem:[#allocation15 + $0x48] sm:$0xff] (!%p1933_p2) }
 0x81e   : > { %v1282_v46 = vadd.f32 1.0, %v2629_v32  ;;  %v2631_v17 = vpop.eup %2630  ;;  %v1611_v32 = vld [vmem:[#allocation15 + $0x60] sm:$0xff] (!%p1933_p2) }
 0x81f   : > { %1319 = vrot.lane.b32.xlu0 %v1317_v61, %s2912_s24  ;;  %v2389_v61 = vpack.c.bf16 (!%p1933_p2), %v1608_v60, %v1607_v50 }
 0x820   : > { %2632 = vrcp.f32 %v1282_v46 }
 0x823   : > { %1491 = vrot.lane.b32.xlu0 %v1315_v43, %s2912_s24  ;;  %v2386_v43 = vpack.c.bf16 (!%p1933_p2), %v1606_v42, %v1605_v41 }
 0x82a   : > { %v2633_v58 = vpop.eup %2632 }
 0x82b   : > { %v1293_v59 = vmul.f32 %v2633_v58, %v2631_v17  ;;  %v1613_v17 = vld [vmem:[#allocation15 + $0x70] sm:$0xff] (!%p1933_p2)  ;;  %v1614_v58 = vld [vmem:[#allocation15 + $0x78] sm:$0xff] (!%p1933_p2) }
 0x891   : > { %v1320_v6 = vpop.permute.xlu0 %1319 }
 0x892   : > { %v1322_v9 = vsel %vm732_vm1, %v1320_v6, %v1293_v59  ;;  %v2398_v59 = vpack.c.bf16 (!%p1933_p2), %v1614_v58, %v1613_v17  ;;  %v1693_v6 = vld [vmem:[#allocation16] sm:$0xff] (!%p1933_p2) }
 0x893   : > { %1388 = vmatmul.mubr.f32.vlgmr.msra.gmra.mrb[6].mxu1 %v1322_v9  ;;  %1459 = vmatmul.mubr.f32.vlgmr.msra.gmra.mrb[8].mxu0 %v1322_v9  ;;  %v1694_v9 = vld [vmem:[#allocation16 + $0x8] sm:$0xff] (!%p1933_p2) }
 0x894   : > { %2003 = vmatprep.mubr.msk.f32.mxu0 (!%p1933_p2), %vm2914_vm2, %v2915_v35  ;;  %2038 = vmatprep.mubr.msk.f32.mxu1 (!%p1933_p2), %vm2914_vm2, %v2915_v35 }
 0x895   : > { %v1492_v10 = vpop.permute.xlu0 %1491  ;;  %2366 = vmatpush3.bf16.msra.mxu0 (!%p1933_p2), %v2365_v27  ;;  %2378 = vmatpush3.bf16.msra.mxu1 (!%p1933_p2), %v2377_v56  ;;  %v1936_v27 = vld [vmem:[%s3640_s29] ss:$0 sm:$0xff] (!%p1933_p2) }
 0x896   : > { %1494 = vst.msk [vmem:[#allocation3] sm:$0xff] %vm732_vm1, %v1492_v10  ;;  %2367 = vmatprep.subr.bf16.mxu0 (!%p1933_p2), %v2913_v26  ;;  %2379 = vmatprep.subr.bf16.mxu1 (!%p1933_p2), %v2913_v26  ;;  %v1695_v10 = vld [vmem:[#allocation16 + $0x10] sm:$0xff] (!%p1933_p2) }
 0x899   : > { %2369 = vmatpush3.bf16.msra.mxu0 (!%p1933_p2), %v2368_v40  ;;  %2381 = vmatpush3.bf16.msra.mxu1 (!%p1933_p2), %v2380_v4  ;;  %v1937_v40 = vld [vmem:[%s3641_s11] ss:$0 sm:$0xff] (!%p1933_p2) }
 0x89a   : > { %2370 = vmatprep.subr.bf16.mxu0 (!%p1933_p2), %v2913_v26  ;;  %2382 = vmatprep.subr.bf16.mxu1 (!%p1933_p2), %v2913_v26 }
 0x89d   : > { %2372 = vmatpush3.bf16.msra.mxu0 (!%p1933_p2), %v2371_v5  ;;  %2384 = vmatpush3.bf16.msra.mxu1 (!%p1933_p2), %v2383_v24 }
 0x89e   : > { %2373 = vmatprep.subr.bf16.mxu0 (!%p1933_p2), %v2913_v26  ;;  %2385 = vmatprep.subr.bf16.mxu1 (!%p1933_p2), %v2913_v26 }
 0x8a1   : > { %2375 = vmatpush3.bf16.msra.mxu0 (!%p1933_p2), %v2374_v30  ;;  %2387 = vmatpush3.bf16.msra.mxu1 (!%p1933_p2), %v2386_v43 }
 0x8a2   : > { %2400 = vmatprep.subr.bf16.mxu0 (!%p1933_p2), %v2913_v26  ;;  %2388 = vmatprep.subr.bf16.mxu1 (!%p1933_p2), %v2913_v26 }
 0x8a5   : > { %2390 = vmatpush3.bf16.msra.mxu1 (!%p1933_p2), %v2389_v61 }
 0x8a6   : > { %2391 = vmatprep.subr.bf16.mxu1 (!%p1933_p2), %v2913_v26 }
 0x8a9   : > { %2393 = vmatpush3.bf16.msra.mxu1 (!%p1933_p2), %v2392_v28 }
 0x8aa   : > { %2394 = vmatprep.subr.bf16.mxu1 (!%p1933_p2), %v2913_v26 }
 0x966   : > { %v1389_v12 = vpop.f32.mrb[6].mxu1  ;;  %v1460_v14 = vpop.f32.mrb[8].mxu0 }
 0x967   : > { %1505 = vst [vmem:[#allocation6] sm:$0xff] %v1389_v12  ;;  %v1465_v16 = vadd.f32 %v1460_v14, %v3406_v52  ;;  %v1391_v21 = vpop.f32.mrb[7].mxu1  ;;  %v1462_v25 = vpop.f32.mrb[9].mxu0  ;;  %v2401_v12 = vpack.c.bf16 (!%p1933_p2), %v1694_v9, %v1693_v6  ;;  %v1696_v14 = vld [vmem:[#allocation16 + $0x18] sm:$0xff] (!%p1933_p2) }
 0x968   : > { %1506 = vst [vmem:[#allocation6 + $0x8] sm:$0xff] %v1391_v21  ;;  %v1466_v3 = vadd.f32 %v1462_v25, %v3412_v15  ;;  %v1697_v21 = vld [vmem:[#allocation16 + $0x20] sm:$0xff] (!%p1933_p2)  ;;  %v1698_v25 = vld [vmem:[#allocation16 + $0x28] sm:$0xff] (!%p1933_p2) }
 0x969   : > { %v1931_v29 = vmul.f32 -1.442695, %v1465_v16  ;;  %v2404_v16 = vpack.c.bf16 (!%p1933_p2), %v1696_v14, %v1695_v10 }
 0x96a   : > { %v1932_v38 = vmul.f32 -1.442695, %v1466_v3 }
 0x96b   : > { %2634 = vpow2.f32 %v1931_v29  ;;  %v2407_v29 = vpack.c.bf16 (!%p1933_p2), %v1698_v25, %v1697_v21 }
 0x96c   : > { %2636 = vtanh.f32 %v1466_v3  ;;  %v1699_v3 = vld [vmem:[#allocation16 + $0x30] sm:$0xff] (!%p1933_p2) }
 0x975   : > { %v2635_v7 = vpop.eup %2634 }
 0x976   : > { %v1470_v54 = vadd.f32 1.0, %v2635_v7  ;;  %v2637_v33 = vpop.eup %2636  ;;  %v1700_v7 = vld [vmem:[#allocation16 + $0x38] sm:$0xff] (!%p1933_p2) }
 0x978   : > { %2638 = vrcp.f32 %v1470_v54  ;;  %v2410_v54 = vpack.c.bf16 (!%p1933_p2), %v1700_v7, %v1699_v3 }
 0x979   : > { %2640 = vpow2.f32 %v1932_v38  ;;  %v1703_v38 = vld [vmem:[#allocation16 + $0x50] sm:$0xff] (!%p1933_p2) }
 0x982   : > { %v2639_v34 = vpop.eup %2638 }
 0x983   : > { %v1481_v37 = vmul.f32 %v2639_v34, %v2637_v33  ;;  %v2641_v53 = vpop.eup %2640  ;;  %v1480_v62 = vmul.f32 %v2639_v34, %v1291_v19  ;;  %v1612_v19 = vld [vmem:[#allocation15 + $0x68] sm:$0xff] (!%p1933_p2)  ;;  %v1701_v33 = vld [vmem:[#allocation16 + $0x40] sm:$0xff] (!%p1933_p2) }
 0x984   : > { %v1477_v52 = vadd.f32 1.0, %v2641_v53  ;;  %v2395_v46 = vpack.c.bf16 (!%p1933_p2), %v1612_v19, %v1611_v32  ;;  %v1702_v34 = vld [vmem:[#allocation16 + $0x48] sm:$0xff] (!%p1933_p2)  ;;  %v1704_v53 = vld [vmem:[#allocation16 + $0x58] sm:$0xff] (!%p1933_p2) }
 0x985   : > { %1483 = vrot.lane.b32.xlu1 %v1481_v37, %s2912_s24  ;;  %v2413_v37 = vpack.c.bf16 (!%p1933_p2), %v1702_v34, %v1701_v33 }
 0x986   : > { %2642 = vrcp.f32 %v1477_v52  ;;  %2396 = vmatpush3.bf16.msra.mxu1 (!%p1933_p2), %v2395_v46  ;;  %v2416_v52 = vpack.c.bf16 (!%p1933_p2), %v1704_v53, %v1703_v38 }
 0x987   : > { %2397 = vmatprep.subr.bf16.mxu1 (!%p1933_p2), %v2913_v26 }
 0x98a   : > { %2399 = vmatpush3.bf16.msra.mxu1 (!%p1933_p2), %v2398_v59 }
 0x990   : > { %v2643_v15 = vpop.eup %2642 }
 0x9f7   : > { %v1484_v51 = vpop.permute.xlu1 %1483 }
 0x9f8   : > { %v1486_v39 = vadd.f32 %v1484_v51, %v1480_v62  ;;  %v1705_v62 = vld [vmem:[#allocation16 + $0x60] sm:$0xff] (!%p1933_p2)  ;;  %v1706_v51 = vld [vmem:[#allocation16 + $0x68] sm:$0xff] (!%p1933_p2) }
 0x9fa   : > { %2644 = vtanh.f32 %v1486_v39  ;;  %1501 = vrot.lane.b32.xlu0 %v1486_v39, %s2912_s24  ;;  %v2419_v39 = vpack.c.bf16 (!%p1933_p2), %v1706_v51, %v1705_v62 }
 0xa04   : > { %v2645_v45 = vpop.eup %2644 }
 0xa05   : > { %v1488_v47 = vmul.f32 %v2645_v45, %v2643_v15  ;;  %v1934_v15 = vld [vmem:[%s3604_s6] ss:$0 sm:$0xff] (!%p1933_p2) }
 0xa07   : > { %1496 = vrot.lane.b32.xlu1 %v1488_v47, %s2912_s24 }
 0xa6c   : > { %v1502_v13 = vpop.permute.xlu0 %1501 }
 0xa6d   : > { %1504 = vst.msk [vmem:[#allocation5] sm:$0xff] %vm732_vm1, %v1502_v13 }
 0xa74   : > { %1510 = sbr.rel (%p1933_p2) target bundleno = 3355 (0xd1b), region = 96 }
 0xa79   : > { %v1497_v57 = vpop.permute.xlu1 %1496 }
 0xa7a   : > { %1499 = vst.msk [vmem:[#allocation4] sm:$0xff] %vm732_vm1, %v1497_v57  ;;  %2004 = vmatmul.mubr.msk.f32.vlgmr.msra.gmra.mrb[0].mxu0 (!%p1933_p2), %vm732_vm1, %v1497_v57 }
 0xa7b   : > { %2073 = vmatprep.mubr.msk.f32.mxu0 %vm2914_vm2, %v2915_v35  ;;  %2402 = vmatpush3.bf16.msra.mxu0 %v2401_v12 }
 0xa7c   : > { %2403 = vmatprep.subr.bf16.mxu0 %v2913_v26 }
 0xa7f   : > { %2405 = vmatpush3.bf16.msra.mxu0 %v2404_v16 }
 0xa80   : > { %2406 = vmatprep.subr.bf16.mxu0 %v2913_v26 }
 0xa83   : > { %2408 = vmatpush3.bf16.msra.mxu0 %v2407_v29 }
 0xa84   : > { %2409 = vmatprep.subr.bf16.mxu0 %v2913_v26 }
 0xa87   : > { %2411 = vmatpush3.bf16.msra.mxu0 %v2410_v54 }
 0xa88   : > { %2412 = vmatprep.subr.bf16.mxu0 %v2913_v26 }
 0xa8b   : > { %2414 = vmatpush3.bf16.msra.mxu0 %v2413_v37 }
 0xa8c   : > { %2415 = vmatprep.subr.bf16.mxu0 %v2913_v26 }
 0xa8f   : > { %2417 = vmatpush3.bf16.msra.mxu0 %v2416_v52 }
 0xa90   : > { %2418 = vmatprep.subr.bf16.mxu0 %v2913_v26 }
 0xa93   : > { %2420 = vmatpush3.bf16.msra.mxu0 %v2419_v39 }
 0xa94   : > { %2421 = vmatprep.subr.bf16.mxu0 %v2913_v26 }
 0xa97   : > { %2423 = vmatpush3.bf16.msra.mxu0 %v2422_v22 }
 0xb4d   : > { %v1594_v45 = vpop.f32.mrb[0].mxu0 }
 0xb4e   : > { %v1595_v47 = vadd.f32 %v1934_v15, %v1594_v45  ;;  %v2005_v13 = vpop.f32.mrb[1].mxu0 }
 0xb50   : > { %v1598_v57 = vmax.f32 %v1595_v47, 0.0 }
 0xb52   : > { %2039 = vmatmul.mubr.f32.vlgmr.msra.gmra.mrb[0].mxu1 %v1598_v57 }
 0xc25   : > { %v1688_v31 = vpop.f32.mrb[0].mxu1 }
 0xc26   : > { %v1689_v35 = vadd.f32 %v1936_v27, %v1688_v31  ;;  %v2040_v26 = vpop.f32.mrb[1].mxu1 }
 0xc28   : > { %v1692_v36 = vmax.f32 %v1689_v35, 0.0 }
 0xc2a   : > { %2074 = vmatmul.mubr.f32.vlgmr.msra.gmra.mrb[2].mxu0 %v1692_v36 }
 0xcfd   : > { %v1782_v44 = vpop.f32.mrb[2].mxu0 }
 0xcfe   : > { %v1783_v48 = vadd.f32 %v1937_v40, %v1782_v44  ;;  %v2075_v49 = vpop.f32.mrb[3].mxu0 }
 0xd00   : > { %v1938_v55 = vmul.f32 -1.442695, %v1783_v48 }
 0xd02   : > { %2646 = vpow2.f32 %v1938_v55 }
 0xd0c   : > { %v2647_v1 = vpop.eup %2646 }
 0xd0d   : > { %v1789_v56 = vadd.f32 1.0, %v2647_v1 }
 0xd0f   : > { %2648 = vrcp.f32 %v1789_v56 }
 0xd19   : > { %v2649_v4 = vpop.eup %2648 }
 0xd1a   : > { %1792 = vst [vmem:[#allocation18] sm:$0xff] %v2649_v4 }
 0xd1b PF: > { %p2493_p5 = scmp.eq.s32.totalorder %s2998_s23, 1  ;;  %s2916_s30 = smov [#allocation18]  }
 0xd1c   : > { %s1800_s12 = sshll.u32 %s2916_s30, 4  ;;  %s1801_s12 = int_to_ptr.vmem [resolvable:$true] %s1800_s12 }
 0xd1d   : > { %s2820_s17 = scalar_lea.vmem %s1801_s12, 128  ;;  %p2827_p1 = scmp.lt.s32.totalorder %s1801_s12, %s1801_s12 }
 0xd1e   : > { %p2821_p9 = scmp.ne.s32.totalorder %s1801_s12, %s2820_s17  ;;  %p2828_p7 = scmp.lt.s32.totalorder %s2820_s17, %s2820_s17 }
 0xd20   : > { %p2822_p10 = pnand %p2821_p9, %p2493_p5  ;;  %p2829_p3 = por %p2828_p7, %p2827_p1 }
 0xd22   : > { %p2823_p8 = pneg %p2822_p10 }
 0xd24   : > { %p2830_p6 = pnand %p2829_p3, %p2823_p8 }
 0xd26   : > { %2833 = shalt.err (!%p2830_p6)
}
 0xd27   : > { %s3642_s22 = sld [smem:[#allocation28_spill]] }
 0xd2d   : > { %s2834_s24 = scalar_lea.hbm %s3642_s22, 128 }
 0xd2e   : > { %p2835_p4 = scmp.ne.s32.totalorder %s3642_s22, %s2834_s24  ;;  %p2840_p13 = scmp.lt.u32.totalorder %s2834_s24, %s3642_s22 }
 0xd30   : > { %p2836_p11 = pnand %p2835_p4, %p2493_p5 }
 0xd32   : > { %p2837_p12 = pneg %p2836_p11 }
 0xd34   : > { %p2842_p0 = pnand %p2840_p13, %p2837_p12 }
 0xd36   : > { %2845 = shalt.err (!%p2842_p0)
}
 0xd37   : > { %2459 = dma.vmem_to_hbm [thread:$0]  (%p2493_p5), %s1801_s12, 128, %s3642_s22, [#allocation9]  }
 0xd38   : > { %2879 = dma.done.wait (%p2493_p5), [#allocation9], 128  }
 0xd39   : > { %2881 = vsyncadd (%p2493_p5), [#allocation9], 4294967168 }
 0xd3a PF: > { %p25_p2 = scmp.ge.s32.totalorder %s3139_s27, 4   ;;  %s3643_s17 = smov %s2888_s18 }
 0xd3b   : > { %s3644_s18 = smov %s2892_s19  ;;  %s3645_s19 = smov %s3150_s1 }
 0xd3c   : > { %s3646_s20 = smov %s3139_s27  ;;  %27 = sbr.rel (!%p25_p2) target bundleno = 13 (0xd), region = 129 }
 0xd43   :  { %1813 = vsyncpa [#allocation8], 1 }
 0xd44   :  { %1815 = vsyncpa [#allocation8 + $0x1], 1 }
 0xd45   :  { %1816 = vsyncpa [#allocation11], 1 }
 0xd46   :  { %1817 = vsyncpa [#allocation14], 1 }
 0xd47   :  { %1818 = vsyncpa [#allocation17], 1 }
 0xd48   :  { %1819 = vsyncpa [#allocation9], 1 }
 0xd49   :  { %1821 = vsyncpa [#allocation9 + $0x1], 1 }

</bundles_post_ra>
